<compile_context>
chip_gen: v7x
topology: tpu7x:2x2x1
jax: 0.10.0
libtpu: 0.0.40
codegen_flags: <defaults>
</compile_context>

<pallas_src>
import math

import jax
import jax.numpy as jnp
from jax.experimental import pallas as pl
from jax.experimental.pallas import tpu as pltpu

MXU_DTYPE = jnp.bfloat16          # matmul operand dtype (accumulation stays f32)
NEG_INF = -1e9
_VMEM_LIMIT = 48 * 1024 * 1024    # safe on v5e/v6e (128 MiB) and v7x (64 MiB)


# ----------------------------------------------------------------------------
# Tiling helper
# ----------------------------------------------------------------------------
def _pick_tile(dim, cap, align):
    """Largest tile <= cap that divides `dim` and is a multiple of `align`.
    Falls back to the full dim (single block) if no such divisor exists."""
    if dim <= cap:
        return dim
    t = (min(cap, dim) // align) * align
    while t >= align:
        if dim % t == 0:
            return t
        t -= align
    return dim


# ----------------------------------------------------------------------------
# Tiled linear kernel:  Y = act(X @ W + b)
# ----------------------------------------------------------------------------
def _make_linear_kernel(activation, has_bias):
    def kernel(*refs):
        if has_bias:
            x_ref, w_ref, b_ref, o_ref, acc_ref = refs
        else:
            x_ref, w_ref, o_ref, acc_ref = refs

        @pl.when(pl.program_id(2) == 0)
        def _():
            acc_ref[...] = jnp.zeros_like(acc_ref)

        acc_ref[...] += jnp.dot(
            x_ref[...].astype(MXU_DTYPE),
            w_ref[...].astype(MXU_DTYPE),
            preferred_element_type=jnp.float32,
        )

        @pl.when(pl.program_id(2) == pl.num_programs(2) - 1)
        def _():
            y = acc_ref[...]
            if has_bias:
                y = y + b_ref[...]
            if activation == "gelu":
                # TODO(synk): tanh-approx GELU (torch F.gelu defaults to exact erf).
                y = 0.5 * y * (1.0 + jnp.tanh(0.7978845608028654 * (y + 0.044715 * y * y * y)))
            elif activation == "tanh":
                y = jnp.tanh(y)
            o_ref[...] = y.astype(o_ref.dtype)

    return kernel


def pallas_linear(x2d, w_t, bias=None, activation=None,
                  tm_cap=256, tn_cap=512, tk_cap=512):
    """x2d: (M, K); w_t: (K, N) pre-transposed weight; bias: (N,) or None."""
    M, K = x2d.shape
    K2, N = w_t.shape
    assert K == K2
    tm = _pick_tile(M, tm_cap, 8)
    tn = _pick_tile(N, tn_cap, 128)
    tk = _pick_tile(K, tk_cap, 128)
    grid = (M // tm, N // tn, K // tk)

    in_specs = [
        pl.BlockSpec((tm, tk), lambda i, j, k: (i, k)),
        pl.BlockSpec((tk, tn), lambda i, j, k: (k, j)),
    ]
    args = [x2d, w_t]
    if bias is not None:
        in_specs.append(pl.BlockSpec((1, tn), lambda i, j, k: (0, j)))
        args.append(bias.reshape(1, N))

    return pl.pallas_call(
        _make_linear_kernel(activation, bias is not None),
        out_shape=jax.ShapeDtypeStruct((M, N), x2d.dtype),
        grid=grid,
        in_specs=in_specs,
        out_specs=pl.BlockSpec((tm, tn), lambda i, j, k: (i, j)),
        scratch_shapes=[pltpu.VMEM((tm, tn), jnp.float32)],
        compiler_params=pltpu.CompilerParams(
            dimension_semantics=("parallel", "parallel", "arbitrary"),
            vmem_limit_bytes=_VMEM_LIMIT),
    )(*args)


# ----------------------------------------------------------------------------
# Tiled linear with fused residual-add + LayerNorm epilogue:
#   Y = LayerNorm(X @ W + b + residual)
# (N = d_model is kept as a single block so LN sees the full feature row.)
# ----------------------------------------------------------------------------
def _linear_res_ln_kernel(x_ref, w_ref, b_ref, r_ref, g_ref, be_ref, o_ref, acc_ref):
    @pl.when(pl.program_id(1) == 0)
    def _():
        acc_ref[...] = jnp.zeros_like(acc_ref)

    acc_ref[...] += jnp.dot(
        x_ref[...].astype(MXU_DTYPE),
        w_ref[...].astype(MXU_DTYPE),
        preferred_element_type=jnp.float32,
    )

    @pl.when(pl.program_id(1) == pl.num_programs(1) - 1)
    def _():
        y = acc_ref[...] + b_ref[...] + r_ref[...]
        mean = jnp.mean(y, axis=-1, keepdims=True)
        var = jnp.mean((y - mean) ** 2, axis=-1, keepdims=True)
        inv = jax.lax.rsqrt(var + 1e-5)            # nn.LayerNorm default eps
        o_ref[...] = ((y - mean) * inv * g_ref[...] + be_ref[...]).astype(o_ref.dtype)


def pallas_linear_residual_layernorm(x2d, w_t, bias, residual, gamma, beta,
                                     tm_cap=256, tk_cap=512):
    M, K = x2d.shape
    K2, N = w_t.shape
    assert K == K2 and residual.shape == (M, N)
    tm = _pick_tile(M, tm_cap, 8)
    tk = _pick_tile(K, tk_cap, 128)
    grid = (M // tm, K // tk)

    return pl.pallas_call(
        _linear_res_ln_kernel,
        out_shape=jax.ShapeDtypeStruct((M, N), x2d.dtype),
        grid=grid,
        in_specs=[
            pl.BlockSpec((tm, tk), lambda i, k: (i, k)),
            pl.BlockSpec((tk, N), lambda i, k: (k, 0)),
            pl.BlockSpec((1, N), lambda i, k: (0, 0)),
            pl.BlockSpec((tm, N), lambda i, k: (i, 0)),
            pl.BlockSpec((1, N), lambda i, k: (0, 0)),
            pl.BlockSpec((1, N), lambda i, k: (0, 0)),
        ],
        out_specs=pl.BlockSpec((tm, N), lambda i, k: (i, 0)),
        scratch_shapes=[pltpu.VMEM((tm, N), jnp.float32)],
        compiler_params=pltpu.CompilerParams(
            dimension_semantics=("parallel", "arbitrary"),
            vmem_limit_bytes=_VMEM_LIMIT),
    )(x2d, w_t, bias.reshape(1, N), residual,
      gamma.reshape(1, N), beta.reshape(1, N))


# ----------------------------------------------------------------------------
# Multi-head attention kernel (all heads of one batch element per grid step)
# ----------------------------------------------------------------------------
def pallas_attention(q, k, v, pad_mask):
    """q, k, v: (B, H, S, dk) f32; pad_mask: (B, 1, S) f32, 1.0 where key is pad.

    Returns context (B, H, S, dk) and attention probabilities (B, H, S, S)."""
    B, H, S, dk = q.shape
    scale = 1.0 / math.sqrt(dk)

    def kernel(q_ref, k_ref, v_ref, m_ref, ctx_ref, prob_ref):
        qh = q_ref[0].astype(MXU_DTYPE)        # (H, S, dk)
        kh = k_ref[0].astype(MXU_DTYPE)
        vh = v_ref[0].astype(MXU_DTYPE)
        # batched scores; contraction on the last axes (no explicit K transpose)
        s = jnp.einsum("hqd,hkd->hqk", qh, kh,
                       preferred_element_type=jnp.float32) * scale
        s = jnp.where(m_ref[...] > 0.5, NEG_INF, s)     # (1,1,S) mask broadcast
        s = s - jnp.max(s, axis=-1, keepdims=True)
        e = jnp.exp(s)
        p = e * pl.reciprocal(jnp.sum(e, axis=-1, keepdims=True), approx=True)
        ctx = jnp.einsum("hqk,hkd->hqd", p.astype(MXU_DTYPE), vh,
                         preferred_element_type=jnp.float32)
        ctx_ref[0] = ctx.astype(ctx_ref.dtype)
        prob_ref[0] = p.astype(prob_ref.dtype)

    return pl.pallas_call(
        kernel,
        out_shape=(
            jax.ShapeDtypeStruct((B, H, S, dk), q.dtype),
            jax.ShapeDtypeStruct((B, H, S, S), q.dtype),
        ),
        grid=(B,),
        in_specs=[
            pl.BlockSpec((1, H, S, dk), lambda b: (b, 0, 0, 0)),
            pl.BlockSpec((1, H, S, dk), lambda b: (b, 0, 0, 0)),
            pl.BlockSpec((1, H, S, dk), lambda b: (b, 0, 0, 0)),
            pl.BlockSpec((1, 1, S), lambda b: (b, 0, 0)),
        ],
        out_specs=(
            pl.BlockSpec((1, H, S, dk), lambda b: (b, 0, 0, 0)),
            pl.BlockSpec((1, H, S, S), lambda b: (b, 0, 0, 0)),
        ),
        compiler_params=pltpu.CompilerParams(
            dimension_semantics=("parallel",),
            vmem_limit_bytes=_VMEM_LIMIT),
    )(q, k, v, pad_mask)


# ----------------------------------------------------------------------------
# Parameter construction (deterministic, synthetic; weights pre-transposed)
# ----------------------------------------------------------------------------
def init_params(key, vocab_size, num_layers, d_model, n_heads, hidden, max_len, segment_type):
    def nrm(k, shape):
        return 0.02 * jax.random.normal(k, shape, dtype=jnp.float32)

    keys = jax.random.split(key, 4 + num_layers)
    params = {
        "tok_emb": nrm(keys[0], (vocab_size, d_model)),   # tied with projection_lm
        "seg_emb": nrm(keys[1], (segment_type, d_model)),
        "pos_emb": nrm(keys[2], (max_len, d_model)),
        "layers": [],
    }
    for li in range(num_layers):
        lk = jax.random.split(keys[4 + li], 6)
        wq = nrm(lk[0], (d_model, d_model))
        wk = nrm(lk[1], (d_model, d_model))
        wv = nrm(lk[2], (d_model, d_model))
        params["layers"].append({
            # all weights stored pre-transposed to (K, N); Q/K/V fused into (D, 3D)
            "wqkv_t": jnp.concatenate([wq.T, wk.T, wv.T], axis=1),
            "bqkv": jnp.zeros((3 * d_model,), jnp.float32),
            "wo_t": nrm(lk[3], (d_model, d_model)).T,
            "bo": jnp.zeros((d_model,), jnp.float32),
            "ln1_g": jnp.ones((d_model,), jnp.float32),
            "ln1_b": jnp.zeros((d_model,), jnp.float32),
            "w1_t": nrm(lk[4], (hidden, d_model)).T,      # (D, hidden)
            "b1": jnp.zeros((hidden,), jnp.float32),
            "w2_t": nrm(lk[5], (d_model, hidden)).T,      # (hidden, D)
            "b2": jnp.zeros((d_model,), jnp.float32),
            "ln2_g": jnp.ones((d_model,), jnp.float32),
            "ln2_b": jnp.zeros((d_model,), jnp.float32),
        })
    pk = jax.random.split(keys[3], 2)
    params["pooler_w_t"] = nrm(pk[0], (d_model, d_model)).T
    params["pooler_b"] = jnp.zeros((d_model,), jnp.float32)
    params["cls_w_t"] = nrm(pk[1], (2, d_model)).T        # (D, 2), bias-free
    return params


# ----------------------------------------------------------------------------
# Forward pass
# ----------------------------------------------------------------------------
def bert_pretrain_forward(params, inputs, segments, n_heads):
    B, S = inputs.shape
    V, D = params["tok_emb"].shape
    H = n_heads
    dk = D // H

    # TODO(synk): embedding gather left in plain JAX (no rectangular BlockSpec form).
    x = (jnp.take(params["tok_emb"], inputs, axis=0)
         + jnp.take(params["seg_emb"], segments, axis=0)
         + params["pos_emb"][None, :S, :])

    # Compact key-padding mask (B, 1, S): 1.0 where key token id == 0.
    pad_mask = (inputs == 0).astype(jnp.float32).reshape(B, 1, S)

    attn_probs_all = []
    h = x.reshape(B * S, D)
    for layer in params["layers"]:
        # Fused Q/K/V projection: one pass over the activations.
        qkv = pallas_linear(h, layer["wqkv_t"], layer["bqkv"])          # (B*S, 3D)
        qkv = qkv.reshape(B, S, 3, H, dk).transpose(2, 0, 3, 1, 4)      # (3, B, H, S, dk)
        ctx, prob = pallas_attention(qkv[0], qkv[1], qkv[2], pad_mask)
        ctx2d = ctx.transpose(0, 2, 1, 3).reshape(B * S, D)

        # Output projection with fused residual + LayerNorm epilogue.
        h1 = pallas_linear_residual_layernorm(
            ctx2d, layer["wo_t"], layer["bo"], h, layer["ln1_g"], layer["ln1_b"])

        # FFN: GELU linear, then second linear with fused residual + LayerNorm.
        ff = pallas_linear(h1, layer["w1_t"], layer["b1"], activation="gelu")
        h = pallas_linear_residual_layernorm(
            ff, layer["w2_t"], layer["b2"], h1, layer["ln2_g"], layer["ln2_b"])

        attn_probs_all.append(prob)                                     # (B, H, S, S)

    outputs = h.reshape(B, S, D)
    cls_tok = outputs[:, 0, :]                                          # (B, D)
    outputs_cls = pallas_linear(cls_tok, params["pooler_w_t"], params["pooler_b"],
                                activation="tanh")

    logits_cls = pallas_linear(outputs_cls, params["cls_w_t"])          # (B, 2), no bias
    # projection_lm shares weights with the token embedding table (transposed once).
    logits_lm = pallas_linear(h, params["tok_emb"].T).reshape(B, S, V)

    attn_probs = jnp.stack(attn_probs_all, axis=0)                      # (L, B, H, S, S)
    return logits_cls, logits_lm, attn_probs


# ----------------------------------------------------------------------------
if __name__ == "__main__":
    VOCAB, LAYERS, D_MODEL, HEADS, HIDDEN, MAX_LEN, SEG = 128, 2, 32, 4, 64, 16, 2
    B, S = 2, 8

    key = jax.random.PRNGKey(0)
    kp, ki, ks = jax.random.split(key, 3)
    params = init_params(kp, VOCAB, LAYERS, D_MODEL, HEADS, HIDDEN, MAX_LEN, SEG)

    inputs = jax.random.randint(ki, (B, S), 1, VOCAB, dtype=jnp.int32)
    inputs = inputs.at[:, -1].set(0)                                    # include padding
    segments = jax.random.randint(ks, (B, S), 0, SEG, dtype=jnp.int32)

    fwd = jax.jit(bert_pretrain_forward, static_argnums=3)
    logits_cls, logits_lm, attn_probs = fwd(params, inputs, segments, HEADS)
    jax.block_until_ready((logits_cls, logits_lm, attn_probs))

    assert logits_cls.shape == (B, 2)
    assert logits_lm.shape == (B, S, VOCAB)
    assert attn_probs.shape == (LAYERS, B, HEADS, S, S)
    assert bool(jnp.all(jnp.isfinite(logits_cls))) and bool(jnp.all(jnp.isfinite(logits_lm)))
    assert bool(jnp.all(jnp.isfinite(attn_probs)))
    print("KERNEL_OK")
</pallas_src>

<mosaic_0001>
module attributes {stable_mosaic.version = 11 : i64} {
  func.func @kernel(%arg0: i32, %arg1: i32, %arg2: i32, %arg3: memref<16x32xf32, #tpu.memory_space<vmem>>, %arg4: memref<32x96xf32, #tpu.memory_space<vmem>>, %arg5: memref<1x96xf32, #tpu.memory_space<vmem>>, %arg6: memref<16x96xf32, #tpu.memory_space<vmem>>, %arg7: memref<16x96xf32, #tpu.memory_space<vmem>>) attributes {dimension_semantics = [#tpu.dimension_semantics<parallel>, #tpu.dimension_semantics<parallel>, #tpu.dimension_semantics<arbitrary>], iteration_bounds = array<i64: 1, 1, 1>, scalar_prefetch = 0 : i64, scratch_operands = 1 : i64, tpu.core_type = #tpu.core_type<tc>, window_params = [{transform_indices = @transform_0, window_bounds = array<i64: 16, 32>}, {transform_indices = @transform_1, window_bounds = array<i64: 32, 96>}, {transform_indices = @transform_2, window_bounds = array<i64: 1, 96>}, {transform_indices = @transform_3, window_bounds = array<i64: 16, 96>}]} {
    %c0_i32 = arith.constant 0 : i32
    %0 = arith.cmpi eq, %arg2, %c0_i32 : i32
    %1 = arith.extui %0 : i1 to i32
    %c0_i32_0 = arith.constant 0 : i32
    %2 = arith.cmpi ne, %1, %c0_i32_0 : i32
    scf.if %2 {
      %cst_10 = arith.constant 0.000000e+00 : f32
      %14 = vector.broadcast %cst_10 : f32 to vector<16x96xf32>
      %c0_11 = arith.constant 0 : index
      %c0_12 = arith.constant 0 : index
      %15 = vector.load %arg7[%c0_11, %c0_12] : memref<16x96xf32, #tpu.memory_space<vmem>>, vector<16x96xf32>
      tpu.vector_store %arg7[%c0_11, %c0_12], %14 {strides = array<i32>} : memref<16x96xf32, #tpu.memory_space<vmem>>, vector<16x96xf32>,
    } else {
    }
    %c0 = arith.constant 0 : index
    %c0_1 = arith.constant 0 : index
    %3 = vector.load %arg7[%c0, %c0_1] : memref<16x96xf32, #tpu.memory_space<vmem>>, vector<16x96xf32>
    %c0_2 = arith.constant 0 : index
    %c0_3 = arith.constant 0 : index
    %4 = vector.load %arg3[%c0_2, %c0_3] : memref<16x32xf32, #tpu.memory_space<vmem>>, vector<16x32xf32>
    %5 = arith.truncf %4 : vector<16x32xf32> to vector<16x32xbf16>
    %c0_4 = arith.constant 0 : index
    %c0_5 = arith.constant 0 : index
    %6 = vector.load %arg4[%c0_4, %c0_5] : memref<32x96xf32, #tpu.memory_space<vmem>>, vector<32x96xf32>
    %7 = arith.truncf %6 : vector<32x96xf32> to vector<32x96xbf16>
    %cst = arith.constant dense<0.000000e+00> : vector<16x96xf32>
    %8 = tpu.matmul %5, %7, %cst {dimension_numbers = #tpu.dot_dimension_numbers<[1], [0], [0], [1], [0, 0, 1, 1], [], []>} : vector<16x32xbf16>, vector<32x96xbf16>, vector<16x96xf32> -> vector<16x96xf32>
    %9 = arith.addf %3, %8 : vector<16x96xf32>
    %c0_6 = arith.constant 0 : index
    %c0_7 = arith.constant 0 : index
    %10 = vector.load %arg7[%c0_6, %c0_7] : memref<16x96xf32, #tpu.memory_space<vmem>>, vector<16x96xf32>
    tpu.vector_store %arg7[%c0_6, %c0_7], %9 {strides = array<i32>} : memref<16x96xf32, #tpu.memory_space<vmem>>, vector<16x96xf32>,
    %c0_i32_8 = arith.constant 0 : i32
    %11 = arith.cmpi eq, %arg2, %c0_i32_8 : i32
    %12 = arith.extui %11 : i1 to i32
    %c0_i32_9 = arith.constant 0 : i32
    %13 = arith.cmpi ne, %12, %c0_i32_9 : i32
    scf.if %13 {
      %c0_10 = arith.constant 0 : index
      %c0_11 = arith.constant 0 : index
      %14 = vector.load %arg7[%c0_10, %c0_11] : memref<16x96xf32, #tpu.memory_space<vmem>>, vector<16x96xf32>
      %c0_12 = arith.constant 0 : index
      %c0_13 = arith.constant 0 : index
      %15 = vector.load %arg5[%c0_12, %c0_13] : memref<1x96xf32, #tpu.memory_space<vmem>>, vector<1x96xf32>
      %16 = vector.broadcast %15 : vector<1x96xf32> to vector<16x96xf32>
      %17 = arith.addf %14, %16 : vector<16x96xf32>
      %c0_14 = arith.constant 0 : index
      %c0_15 = arith.constant 0 : index
      %18 = vector.load %arg6[%c0_14, %c0_15] : memref<16x96xf32, #tpu.memory_space<vmem>>, vector<16x96xf32>
      tpu.vector_store %arg6[%c0_14, %c0_15], %17 {strides = array<i32>} : memref<16x96xf32, #tpu.memory_space<vmem>>, vector<16x96xf32>,
    } else {
    }
    return
  }
  func.func @transform_0(%arg0: i32, %arg1: i32, %arg2: i32) -> (i32, i32) {
    %c0_i32 = arith.constant 0 : i32
    return %arg0, %arg2 : i32, i32
  }
  func.func @transform_1(%arg0: i32, %arg1: i32, %arg2: i32) -> (i32, i32) {
    %c0_i32 = arith.constant 0 : i32
    return %arg2, %arg1 : i32, i32
  }
  func.func @transform_2(%arg0: i32, %arg1: i32, %arg2: i32) -> (i32, i32) {
    %c0_i32 = arith.constant 0 : i32
    %c0_i32_0 = arith.constant 0 : i32
    return %c0_i32, %arg1 : i32, i32
  }
  func.func @transform_3(%arg0: i32, %arg1: i32, %arg2: i32) -> (i32, i32) {
    %c0_i32 = arith.constant 0 : i32
    return %arg0, %arg1 : i32, i32
  }
}

module attributes {stable_mosaic.version = 11 : i64} {
  func.func @kernel(%arg0: i32, %arg1: memref<1x4x8x8xf32, #tpu.memory_space<vmem>>, %arg2: memref<1x4x8x8xf32, #tpu.memory_space<vmem>>, %arg3: memref<1x4x8x8xf32, #tpu.memory_space<vmem>>, %arg4: memref<1x1x8xf32, #tpu.memory_space<vmem>>, %arg5: memref<1x4x8x8xf32, #tpu.memory_space<vmem>>, %arg6: memref<1x4x8x8xf32, #tpu.memory_space<vmem>>) attributes {dimension_semantics = [#tpu.dimension_semantics<parallel>], iteration_bounds = array<i64: 2>, scalar_prefetch = 0 : i64, scratch_operands = 0 : i64, tpu.core_type = #tpu.core_type<tc>, window_params = [{transform_indices = @transform_0, window_bounds = array<i64: 1, 4, 8, 8>}, {transform_indices = @transform_1, window_bounds = array<i64: 1, 4, 8, 8>}, {transform_indices = @transform_2, window_bounds = array<i64: 1, 4, 8, 8>}, {transform_indices = @transform_3, window_bounds = array<i64: 1, 1, 8>}, {transform_indices = @transform_4, window_bounds = array<i64: 1, 4, 8, 8>}, {transform_indices = @transform_5, window_bounds = array<i64: 1, 4, 8, 8>}]} {
    %c0 = arith.constant 0 : index
    %c0_0 = arith.constant 0 : index
    %c0_1 = arith.constant 0 : index
    %c0_2 = arith.constant 0 : index
    %0 = vector.load %arg1[%c0, %c0_0, %c0_1, %c0_2] : memref<1x4x8x8xf32, #tpu.memory_space<vmem>>, vector<1x4x8x8xf32>
    %1 = vector.shape_cast %0 : vector<1x4x8x8xf32> to vector<4x8x8xf32>
    %2 = arith.truncf %1 : vector<4x8x8xf32> to vector<4x8x8xbf16>
    %c0_3 = arith.constant 0 : index
    %c0_4 = arith.constant 0 : index
    %c0_5 = arith.constant 0 : index
    %c0_6 = arith.constant 0 : index
    %3 = vector.load %arg2[%c0_3, %c0_4, %c0_5, %c0_6] : memref<1x4x8x8xf32, #tpu.memory_space<vmem>>, vector<1x4x8x8xf32>
    %4 = vector.shape_cast %3 : vector<1x4x8x8xf32> to vector<4x8x8xf32>
    %5 = arith.truncf %4 : vector<4x8x8xf32> to vector<4x8x8xbf16>
    %c0_7 = arith.constant 0 : index
    %c0_8 = arith.constant 0 : index
    %c0_9 = arith.constant 0 : index
    %c0_10 = arith.constant 0 : index
    %6 = vector.load %arg3[%c0_7, %c0_8, %c0_9, %c0_10] : memref<1x4x8x8xf32, #tpu.memory_space<vmem>>, vector<1x4x8x8xf32>
    %7 = vector.shape_cast %6 : vector<1x4x8x8xf32> to vector<4x8x8xf32>
    %8 = arith.truncf %7 : vector<4x8x8xf32> to vector<4x8x8xbf16>
    "tpu.trace_start"() <{level = 10 : i32, message = "hqd,hkd->hqk"}> : () -> ()
    %cst = arith.constant dense<0.000000e+00> : vector<4x8x8xf32>
    %9 = tpu.matmul %2, %5, %cst {dimension_numbers = #tpu.dot_dimension_numbers<[2], [2], [1], [1], [0, 0, 0, 1, 1, 1], [0], [0]>} : vector<4x8x8xbf16>, vector<4x8x8xbf16>, vector<4x8x8xf32> -> vector<4x8x8xf32>
    "tpu.trace_stop"() : () -> ()
    %cst_11 = arith.constant 0.353553385 : f32
    %10 = vector.broadcast %cst_11 : f32 to vector<4x8x8xf32>
    %11 = arith.mulf %9, %10 : vector<4x8x8xf32>
    %c0_12 = arith.constant 0 : index
    %c0_13 = arith.constant 0 : index
    %c0_14 = arith.constant 0 : index
    %12 = vector.load %arg4[%c0_12, %c0_13, %c0_14] : memref<1x1x8xf32, #tpu.memory_space<vmem>>, vector<1x1x8xf32>
    %cst_15 = arith.constant 5.000000e-01 : f32
    %13 = vector.broadcast %cst_15 : f32 to vector<1x1x8xf32>
    %14 = arith.cmpf ogt, %12, %13 : vector<1x1x8xf32>
    %cst_16 = arith.constant -1.000000e+09 : f32
    %15 = vector.shape_cast %14 : vector<1x1x8xi1> to vector<1x1x8xi1>
    %16 = vector.broadcast %15 : vector<1x1x8xi1> to vector<4x8x8xi1>
    %17 = vector.broadcast %cst_16 : f32 to vector<4x8x8xf32>
    %18 = arith.select %16, %17, %11 : vector<4x8x8xi1>, vector<4x8x8xf32>
    %cst_17 = arith.constant dense<0xFF800000> : vector<4x8xf32>
    %19 = vector.multi_reduction <maximumf>, %18, %cst_17 [2] : vector<4x8x8xf32> to vector<4x8xf32>
    %20 = vector.shape_cast %19 : vector<4x8xf32> to vector<4x8x1xf32>
    %21 = vector.broadcast %20 : vector<4x8x1xf32> to vector<4x8x8xf32>
    %22 = arith.subf %18, %21 : vector<4x8x8xf32>
    %23 = math.exp %22 : vector<4x8x8xf32>
    %cst_18 = arith.constant dense<0.000000e+00> : vector<4x8xf32>
    %24 = vector.multi_reduction <add>, %23, %cst_18 [2] : vector<4x8x8xf32> to vector<4x8xf32>
    %25 = vector.shape_cast %24 : vector<4x8xf32> to vector<4x8x1xf32>
    %26 = tpu.reciprocal %25 {approx = true} : vector<4x8x1xf32> -> vector<4x8x1xf32>
    %27 = vector.broadcast %26 : vector<4x8x1xf32> to vector<4x8x8xf32>
    %28 = arith.mulf %23, %27 : vector<4x8x8xf32>
    %29 = arith.truncf %28 : vector<4x8x8xf32> to vector<4x8x8xbf16>
    "tpu.trace_start"() <{level = 10 : i32, message = "hqk,hkd->hqd"}> : () -> ()
    %cst_19 = arith.constant dense<0.000000e+00> : vector<4x8x8xf32>
    %30 = tpu.matmul %29, %8, %cst_19 {dimension_numbers = #tpu.dot_dimension_numbers<[2], [1], [1], [2], [0, 0, 0, 1, 1, 2], [0], [0]>} : vector<4x8x8xbf16>, vector<4x8x8xbf16>, vector<4x8x8xf32> -> vector<4x8x8xf32>
    "tpu.trace_stop"() : () -> ()
    %c0_20 = arith.constant 0 : index
    %c0_21 = arith.constant 0 : index
    %c0_22 = arith.constant 0 : index
    %c0_23 = arith.constant 0 : index
    %31 = vector.load %arg5[%c0_20, %c0_21, %c0_22, %c0_23] : memref<1x4x8x8xf32, #tpu.memory_space<vmem>>, vector<1x4x8x8xf32>
    %32 = vector.shape_cast %31 : vector<1x4x8x8xf32> to vector<4x8x8xf32>
    %33 = vector.shape_cast %30 : vector<4x8x8xf32> to vector<1x4x8x8xf32>
    tpu.vector_store %arg5[%c0_20, %c0_21, %c0_22, %c0_23], %33 {strides = array<i32>} : memref<1x4x8x8xf32, #tpu.memory_space<vmem>>, vector<1x4x8x8xf32>,
    %c0_24 = arith.constant 0 : index
    %c0_25 = arith.constant 0 : index
    %c0_26 = arith.constant 0 : index
    %c0_27 = arith.constant 0 : index
    %34 = vector.load %arg6[%c0_24, %c0_25, %c0_26, %c0_27] : memref<1x4x8x8xf32, #tpu.memory_space<vmem>>, vector<1x4x8x8xf32>
    %35 = vector.shape_cast %34 : vector<1x4x8x8xf32> to vector<4x8x8xf32>
    %36 = vector.shape_cast %28 : vector<4x8x8xf32> to vector<1x4x8x8xf32>
    tpu.vector_store %arg6[%c0_24, %c0_25, %c0_26, %c0_27], %36 {strides = array<i32>} : memref<1x4x8x8xf32, #tpu.memory_space<vmem>>, vector<1x4x8x8xf32>,
    return
  }
  func.func @transform_0(%arg0: i32) -> (i32, i32, i32, i32) {
    %c0_i32 = arith.constant 0 : i32
    %c0_i32_0 = arith.constant 0 : i32
    %c0_i32_1 = arith.constant 0 : i32
    %c0_i32_2 = arith.constant 0 : i32
    return %arg0, %c0_i32, %c0_i32_0, %c0_i32_1 : i32, i32, i32, i32
  }
  func.func @transform_1(%arg0: i32) -> (i32, i32, i32, i32) {
    %c0_i32 = arith.constant 0 : i32
    %c0_i32_0 = arith.constant 0 : i32
    %c0_i32_1 = arith.constant 0 : i32
    %c0_i32_2 = arith.constant 0 : i32
    return %arg0, %c0_i32, %c0_i32_0, %c0_i32_1 : i32, i32, i32, i32
  }
  func.func @transform_2(%arg0: i32) -> (i32, i32, i32, i32) {
    %c0_i32 = arith.constant 0 : i32
    %c0_i32_0 = arith.constant 0 : i32
    %c0_i32_1 = arith.constant 0 : i32
    %c0_i32_2 = arith.constant 0 : i32
    return %arg0, %c0_i32, %c0_i32_0, %c0_i32_1 : i32, i32, i32, i32
  }
  func.func @transform_3(%arg0: i32) -> (i32, i32, i32) {
    %c0_i32 = arith.constant 0 : i32
    %c0_i32_0 = arith.constant 0 : i32
    %c0_i32_1 = arith.constant 0 : i32
    return %arg0, %c0_i32, %c0_i32_0 : i32, i32, i32
  }
  func.func @transform_4(%arg0: i32) -> (i32, i32, i32, i32) {
    %c0_i32 = arith.constant 0 : i32
    %c0_i32_0 = arith.constant 0 : i32
    %c0_i32_1 = arith.constant 0 : i32
    %c0_i32_2 = arith.constant 0 : i32
    return %arg0, %c0_i32, %c0_i32_0, %c0_i32_1 : i32, i32, i32, i32
  }
  func.func @transform_5(%arg0: i32) -> (i32, i32, i32, i32) {
    %c0_i32 = arith.constant 0 : i32
    %c0_i32_0 = arith.constant 0 : i32
    %c0_i32_1 = arith.constant 0 : i32
    %c0_i32_2 = arith.constant 0 : i32
    return %arg0, %c0_i32, %c0_i32_0, %c0_i32_1 : i32, i32, i32, i32
  }
}

module attributes {stable_mosaic.version = 11 : i64} {
  func.func @_linear_res_ln_kernel(%arg0: i32, %arg1: i32, %arg2: memref<16x32xf32, #tpu.memory_space<vmem>>, %arg3: memref<32x32xf32, #tpu.memory_space<vmem>>, %arg4: memref<1x32xf32, #tpu.memory_space<vmem>>, %arg5: memref<16x32xf32, #tpu.memory_space<vmem>>, %arg6: memref<1x32xf32, #tpu.memory_space<vmem>>, %arg7: memref<1x32xf32, #tpu.memory_space<vmem>>, %arg8: memref<16x32xf32, #tpu.memory_space<vmem>>, %arg9: memref<16x32xf32, #tpu.memory_space<vmem>>) attributes {dimension_semantics = [#tpu.dimension_semantics<parallel>, #tpu.dimension_semantics<arbitrary>], iteration_bounds = array<i64: 1, 1>, scalar_prefetch = 0 : i64, scratch_operands = 1 : i64, tpu.core_type = #tpu.core_type<tc>, window_params = [{transform_indices = @transform_0, window_bounds = array<i64: 16, 32>}, {transform_indices = @transform_1, window_bounds = array<i64: 32, 32>}, {pipeline_mode = #tpu.pipeline_mode<synchronous>, transform_indices = @transform_2, window_bounds = array<i64: 1, 32>}, {transform_indices = @transform_3, window_bounds = array<i64: 16, 32>}, {pipeline_mode = #tpu.pipeline_mode<synchronous>, transform_indices = @transform_4, window_bounds = array<i64: 1, 32>}, {pipeline_mode = #tpu.pipeline_mode<synchronous>, transform_indices = @transform_5, window_bounds = array<i64: 1, 32>}, {transform_indices = @transform_6, window_bounds = array<i64: 16, 32>}]} {
    %c0_i32 = arith.constant 0 : i32
    %0 = arith.cmpi eq, %arg1, %c0_i32 : i32
    %1 = arith.extui %0 : i1 to i32
    %c0_i32_0 = arith.constant 0 : i32
    %2 = arith.cmpi ne, %1, %c0_i32_0 : i32
    scf.if %2 {
      %cst_10 = arith.constant 0.000000e+00 : f32
      %14 = vector.broadcast %cst_10 : f32 to vector<16x32xf32>
      %c0_11 = arith.constant 0 : index
      %c0_12 = arith.constant 0 : index
      %15 = vector.load %arg9[%c0_11, %c0_12] : memref<16x32xf32, #tpu.memory_space<vmem>>, vector<16x32xf32>
      tpu.vector_store %arg9[%c0_11, %c0_12], %14 {strides = array<i32>} : memref<16x32xf32, #tpu.memory_space<vmem>>, vector<16x32xf32>,
    } else {
    }
    %c0 = arith.constant 0 : index
    %c0_1 = arith.constant 0 : index
    %3 = vector.load %arg9[%c0, %c0_1] : memref<16x32xf32, #tpu.memory_space<vmem>>, vector<16x32xf32>
    %c0_2 = arith.constant 0 : index
    %c0_3 = arith.constant 0 : index
    %4 = vector.load %arg2[%c0_2, %c0_3] : memref<16x32xf32, #tpu.memory_space<vmem>>, vector<16x32xf32>
    %5 = arith.truncf %4 : vector<16x32xf32> to vector<16x32xbf16>
    %c0_4 = arith.constant 0 : index
    %c0_5 = arith.constant 0 : index
    %6 = vector.load %arg3[%c0_4, %c0_5] : memref<32x32xf32, #tpu.memory_space<vmem>>, vector<32x32xf32>
    %7 = arith.truncf %6 : vector<32x32xf32> to vector<32x32xbf16>
    %cst = arith.constant dense<0.000000e+00> : vector<16x32xf32>
    %8 = tpu.matmul %5, %7, %cst {dimension_numbers = #tpu.dot_dimension_numbers<[1], [0], [0], [1], [0, 0, 1, 1], [], []>} : vector<16x32xbf16>, vector<32x32xbf16>, vector<16x32xf32> -> vector<16x32xf32>
    %9 = arith.addf %3, %8 : vector<16x32xf32>
    %c0_6 = arith.constant 0 : index
    %c0_7 = arith.constant 0 : index
    %10 = vector.load %arg9[%c0_6, %c0_7] : memref<16x32xf32, #tpu.memory_space<vmem>>, vector<16x32xf32>
    tpu.vector_store %arg9[%c0_6, %c0_7], %9 {strides = array<i32>} : memref<16x32xf32, #tpu.memory_space<vmem>>, vector<16x32xf32>,
    %c0_i32_8 = arith.constant 0 : i32
    %11 = arith.cmpi eq, %arg1, %c0_i32_8 : i32
    %12 = arith.extui %11 : i1 to i32
    %c0_i32_9 = arith.constant 0 : i32
    %13 = arith.cmpi ne, %12, %c0_i32_9 : i32
    scf.if %13 {
      %c0_10 = arith.constant 0 : index
      %c0_11 = arith.constant 0 : index
      %14 = vector.load %arg9[%c0_10, %c0_11] : memref<16x32xf32, #tpu.memory_space<vmem>>, vector<16x32xf32>
      %c0_12 = arith.constant 0 : index
      %c0_13 = arith.constant 0 : index
      %15 = vector.load %arg4[%c0_12, %c0_13] : memref<1x32xf32, #tpu.memory_space<vmem>>, vector<1x32xf32>
      %16 = vector.broadcast %15 : vector<1x32xf32> to vector<16x32xf32>
      %17 = arith.addf %14, %16 : vector<16x32xf32>
      %c0_14 = arith.constant 0 : index
      %c0_15 = arith.constant 0 : index
      %18 = vector.load %arg5[%c0_14, %c0_15] : memref<16x32xf32, #tpu.memory_space<vmem>>, vector<16x32xf32>
      %19 = arith.addf %17, %18 : vector<16x32xf32>
      %cst_16 = arith.constant dense<0.000000e+00> : vector<16xf32>
      %20 = vector.multi_reduction <add>, %19, %cst_16 [1] : vector<16x32xf32> to vector<16xf32>
      %21 = vector.shape_cast %20 : vector<16xf32> to vector<16x1xf32>
      %cst_17 = arith.constant 3.200000e+01 : f32
      %22 = vector.broadcast %cst_17 : f32 to vector<16x1xf32>
      %23 = arith.divf %21, %22 : vector<16x1xf32>
      %24 = vector.broadcast %23 : vector<16x1xf32> to vector<16x32xf32>
      %25 = arith.subf %19, %24 : vector<16x32xf32>
      %26 = arith.mulf %25, %25 : vector<16x32xf32>
      %cst_18 = arith.constant dense<0.000000e+00> : vector<16xf32>
      %27 = vector.multi_reduction <add>, %26, %cst_18 [1] : vector<16x32xf32> to vector<16xf32>
      %28 = vector.shape_cast %27 : vector<16xf32> to vector<16x1xf32>
      %cst_19 = arith.constant 3.200000e+01 : f32
      %29 = vector.broadcast %cst_19 : f32 to vector<16x1xf32>
      %30 = arith.divf %28, %29 : vector<16x1xf32>
      %cst_20 = arith.constant 9.99999974E-6 : f32
      %31 = vector.broadcast %cst_20 : f32 to vector<16x1xf32>
      %32 = arith.addf %30, %31 : vector<16x1xf32>
      %33 = math.rsqrt %32 : vector<16x1xf32>
      %34 = vector.broadcast %23 : vector<16x1xf32> to vector<16x32xf32>
      %35 = arith.subf %19, %34 : vector<16x32xf32>
      %36 = vector.broadcast %33 : vector<16x1xf32> to vector<16x32xf32>
      %37 = arith.mulf %35, %36 : vector<16x32xf32>
      %c0_21 = arith.constant 0 : index
      %c0_22 = arith.constant 0 : index
      %38 = vector.load %arg6[%c0_21, %c0_22] : memref<1x32xf32, #tpu.memory_space<vmem>>, vector<1x32xf32>
      %39 = vector.broadcast %38 : vector<1x32xf32> to vector<16x32xf32>
      %40 = arith.mulf %37, %39 : vector<16x32xf32>
      %c0_23 = arith.constant 0 : index
      %c0_24 = arith.constant 0 : index
      %41 = vector.load %arg7[%c0_23, %c0_24] : memref<1x32xf32, #tpu.memory_space<vmem>>, vector<1x32xf32>
      %42 = vector.broadcast %41 : vector<1x32xf32> to vector<16x32xf32>
      %43 = arith.addf %40, %42 : vector<16x32xf32>
      %c0_25 = arith.constant 0 : index
      %c0_26 = arith.constant 0 : index
      %44 = vector.load %arg8[%c0_25, %c0_26] : memref<16x32xf32, #tpu.memory_space<vmem>>, vector<16x32xf32>
      tpu.vector_store %arg8[%c0_25, %c0_26], %43 {strides = array<i32>} : memref<16x32xf32, #tpu.memory_space<vmem>>, vector<16x32xf32>,
    } else {
    }
    return
  }
  func.func @transform_0(%arg0: i32, %arg1: i32) -> (i32, i32) {
    %c0_i32 = arith.constant 0 : i32
    return %arg0, %arg1 : i32, i32
  }
  func.func @transform_1(%arg0: i32, %arg1: i32) -> (i32, i32) {
    %c0_i32 = arith.constant 0 : i32
    %c0_i32_0 = arith.constant 0 : i32
    return %arg1, %c0_i32 : i32, i32
  }
  func.func @transform_2(%arg0: i32, %arg1: i32) -> (i32, i32) {
    %c0_i32 = arith.constant 0 : i32
    %c0_i32_0 = arith.constant 0 : i32
    %c0_i32_1 = arith.constant 0 : i32
    return %c0_i32, %c0_i32_0 : i32, i32
  }
  func.func @transform_3(%arg0: i32, %arg1: i32) -> (i32, i32) {
    %c0_i32 = arith.constant 0 : i32
    %c0_i32_0 = arith.constant 0 : i32
    return %arg0, %c0_i32 : i32, i32
  }
  func.func @transform_4(%arg0: i32, %arg1: i32) -> (i32, i32) {
    %c0_i32 = arith.constant 0 : i32
    %c0_i32_0 = arith.constant 0 : i32
    %c0_i32_1 = arith.constant 0 : i32
    return %c0_i32, %c0_i32_0 : i32, i32
  }
  func.func @transform_5(%arg0: i32, %arg1: i32) -> (i32, i32) {
    %c0_i32 = arith.constant 0 : i32
    %c0_i32_0 = arith.constant 0 : i32
    %c0_i32_1 = arith.constant 0 : i32
    return %c0_i32, %c0_i32_0 : i32, i32
  }
  func.func @transform_6(%arg0: i32, %arg1: i32) -> (i32, i32) {
    %c0_i32 = arith.constant 0 : i32
    %c0_i32_0 = arith.constant 0 : i32
    return %arg0, %c0_i32 : i32, i32
  }
}

module attributes {stable_mosaic.version = 11 : i64} {
  func.func @kernel(%arg0: i32, %arg1: i32, %arg2: i32, %arg3: memref<16x32xf32, #tpu.memory_space<vmem>>, %arg4: memref<32x64xf32, #tpu.memory_space<vmem>>, %arg5: memref<1x64xf32, #tpu.memory_space<vmem>>, %arg6: memref<16x64xf32, #tpu.memory_space<vmem>>, %arg7: memref<16x64xf32, #tpu.memory_space<vmem>>) attributes {dimension_semantics = [#tpu.dimension_semantics<parallel>, #tpu.dimension_semantics<parallel>, #tpu.dimension_semantics<arbitrary>], iteration_bounds = array<i64: 1, 1, 1>, scalar_prefetch = 0 : i64, scratch_operands = 1 : i64, tpu.core_type = #tpu.core_type<tc>, window_params = [{transform_indices = @transform_0, window_bounds = array<i64: 16, 32>}, {transform_indices = @transform_1, window_bounds = array<i64: 32, 64>}, {transform_indices = @transform_2, window_bounds = array<i64: 1, 64>}, {transform_indices = @transform_3, window_bounds = array<i64: 16, 64>}]} {
    %c0_i32 = arith.constant 0 : i32
    %0 = arith.cmpi eq, %arg2, %c0_i32 : i32
    %1 = arith.extui %0 : i1 to i32
    %c0_i32_0 = arith.constant 0 : i32
    %2 = arith.cmpi ne, %1, %c0_i32_0 : i32
    scf.if %2 {
      %cst_10 = arith.constant 0.000000e+00 : f32
      %14 = vector.broadcast %cst_10 : f32 to vector<16x64xf32>
      %c0_11 = arith.constant 0 : index
      %c0_12 = arith.constant 0 : index
      %15 = vector.load %arg7[%c0_11, %c0_12] : memref<16x64xf32, #tpu.memory_space<vmem>>, vector<16x64xf32>
      tpu.vector_store %arg7[%c0_11, %c0_12], %14 {strides = array<i32>} : memref<16x64xf32, #tpu.memory_space<vmem>>, vector<16x64xf32>,
    } else {
    }
    %c0 = arith.constant 0 : index
    %c0_1 = arith.constant 0 : index
    %3 = vector.load %arg7[%c0, %c0_1] : memref<16x64xf32, #tpu.memory_space<vmem>>, vector<16x64xf32>
    %c0_2 = arith.constant 0 : index
    %c0_3 = arith.constant 0 : index
    %4 = vector.load %arg3[%c0_2, %c0_3] : memref<16x32xf32, #tpu.memory_space<vmem>>, vector<16x32xf32>
    %5 = arith.truncf %4 : vector<16x32xf32> to vector<16x32xbf16>
    %c0_4 = arith.constant 0 : index
    %c0_5 = arith.constant 0 : index
    %6 = vector.load %arg4[%c0_4, %c0_5] : memref<32x64xf32, #tpu.memory_space<vmem>>, vector<32x64xf32>
    %7 = arith.truncf %6 : vector<32x64xf32> to vector<32x64xbf16>
    %cst = arith.constant dense<0.000000e+00> : vector<16x64xf32>
    %8 = tpu.matmul %5, %7, %cst {dimension_numbers = #tpu.dot_dimension_numbers<[1], [0], [0], [1], [0, 0, 1, 1], [], []>} : vector<16x32xbf16>, vector<32x64xbf16>, vector<16x64xf32> -> vector<16x64xf32>
    %9 = arith.addf %3, %8 : vector<16x64xf32>
    %c0_6 = arith.constant 0 : index
    %c0_7 = arith.constant 0 : index
    %10 = vector.load %arg7[%c0_6, %c0_7] : memref<16x64xf32, #tpu.memory_space<vmem>>, vector<16x64xf32>
    tpu.vector_store %arg7[%c0_6, %c0_7], %9 {strides = array<i32>} : memref<16x64xf32, #tpu.memory_space<vmem>>, vector<16x64xf32>,
    %c0_i32_8 = arith.constant 0 : i32
    %11 = arith.cmpi eq, %arg2, %c0_i32_8 : i32
    %12 = arith.extui %11 : i1 to i32
    %c0_i32_9 = arith.constant 0 : i32
    %13 = arith.cmpi ne, %12, %c0_i32_9 : i32
    scf.if %13 {
      %c0_10 = arith.constant 0 : index
      %c0_11 = arith.constant 0 : index
      %14 = vector.load %arg7[%c0_10, %c0_11] : memref<16x64xf32, #tpu.memory_space<vmem>>, vector<16x64xf32>
      %c0_12 = arith.constant 0 : index
      %c0_13 = arith.constant 0 : index
      %15 = vector.load %arg5[%c0_12, %c0_13] : memref<1x64xf32, #tpu.memory_space<vmem>>, vector<1x64xf32>
      %16 = vector.broadcast %15 : vector<1x64xf32> to vector<16x64xf32>
      %17 = arith.addf %14, %16 : vector<16x64xf32>
      %cst_14 = arith.constant 5.000000e-01 : f32
      %18 = vector.broadcast %cst_14 : f32 to vector<16x64xf32>
      %19 = arith.mulf %18, %17 : vector<16x64xf32>
      %cst_15 = arith.constant 4.471500e-02 : f32
      %20 = vector.broadcast %cst_15 : f32 to vector<16x64xf32>
      %21 = arith.mulf %20, %17 : vector<16x64xf32>
      %22 = arith.mulf %21, %17 : vector<16x64xf32>
      %23 = arith.mulf %22, %17 : vector<16x64xf32>
      %24 = arith.addf %17, %23 : vector<16x64xf32>
      %cst_16 = arith.constant 0.797884583 : f32
      %25 = vector.broadcast %cst_16 : f32 to vector<16x64xf32>
      %26 = arith.mulf %25, %24 : vector<16x64xf32>
      %27 = math.tanh %26 : vector<16x64xf32>
      %cst_17 = arith.constant 1.000000e+00 : f32
      %28 = vector.broadcast %cst_17 : f32 to vector<16x64xf32>
      %29 = arith.addf %28, %27 : vector<16x64xf32>
      %30 = arith.mulf %19, %29 : vector<16x64xf32>
      %c0_18 = arith.constant 0 : index
      %c0_19 = arith.constant 0 : index
      %31 = vector.load %arg6[%c0_18, %c0_19] : memref<16x64xf32, #tpu.memory_space<vmem>>, vector<16x64xf32>
      tpu.vector_store %arg6[%c0_18, %c0_19], %30 {strides = array<i32>} : memref<16x64xf32, #tpu.memory_space<vmem>>, vector<16x64xf32>,
    } else {
    }
    return
  }
  func.func @transform_0(%arg0: i32, %arg1: i32, %arg2: i32) -> (i32, i32) {
    %c0_i32 = arith.constant 0 : i32
    return %arg0, %arg2 : i32, i32
  }
  func.func @transform_1(%arg0: i32, %arg1: i32, %arg2: i32) -> (i32, i32) {
    %c0_i32 = arith.constant 0 : i32
    return %arg2, %arg1 : i32, i32
  }
  func.func @transform_2(%arg0: i32, %arg1: i32, %arg2: i32) -> (i32, i32) {
    %c0_i32 = arith.constant 0 : i32
    %c0_i32_0 = arith.constant 0 : i32
    return %c0_i32, %arg1 : i32, i32
  }
  func.func @transform_3(%arg0: i32, %arg1: i32, %arg2: i32) -> (i32, i32) {
    %c0_i32 = arith.constant 0 : i32
    return %arg0, %arg1 : i32, i32
  }
}

module attributes {stable_mosaic.version = 11 : i64} {
  func.func @_linear_res_ln_kernel(%arg0: i32, %arg1: i32, %arg2: memref<16x64xf32, #tpu.memory_space<vmem>>, %arg3: memref<64x32xf32, #tpu.memory_space<vmem>>, %arg4: memref<1x32xf32, #tpu.memory_space<vmem>>, %arg5: memref<16x32xf32, #tpu.memory_space<vmem>>, %arg6: memref<1x32xf32, #tpu.memory_space<vmem>>, %arg7: memref<1x32xf32, #tpu.memory_space<vmem>>, %arg8: memref<16x32xf32, #tpu.memory_space<vmem>>, %arg9: memref<16x32xf32, #tpu.memory_space<vmem>>) attributes {dimension_semantics = [#tpu.dimension_semantics<parallel>, #tpu.dimension_semantics<arbitrary>], iteration_bounds = array<i64: 1, 1>, scalar_prefetch = 0 : i64, scratch_operands = 1 : i64, tpu.core_type = #tpu.core_type<tc>, window_params = [{transform_indices = @transform_0, window_bounds = array<i64: 16, 64>}, {transform_indices = @transform_1, window_bounds = array<i64: 64, 32>}, {pipeline_mode = #tpu.pipeline_mode<synchronous>, transform_indices = @transform_2, window_bounds = array<i64: 1, 32>}, {transform_indices = @transform_3, window_bounds = array<i64: 16, 32>}, {pipeline_mode = #tpu.pipeline_mode<synchronous>, transform_indices = @transform_4, window_bounds = array<i64: 1, 32>}, {pipeline_mode = #tpu.pipeline_mode<synchronous>, transform_indices = @transform_5, window_bounds = array<i64: 1, 32>}, {transform_indices = @transform_6, window_bounds = array<i64: 16, 32>}]} {
    %c0_i32 = arith.constant 0 : i32
    %0 = arith.cmpi eq, %arg1, %c0_i32 : i32
    %1 = arith.extui %0 : i1 to i32
    %c0_i32_0 = arith.constant 0 : i32
    %2 = arith.cmpi ne, %1, %c0_i32_0 : i32
    scf.if %2 {
      %cst_10 = arith.constant 0.000000e+00 : f32
      %14 = vector.broadcast %cst_10 : f32 to vector<16x32xf32>
      %c0_11 = arith.constant 0 : index
      %c0_12 = arith.constant 0 : index
      %15 = vector.load %arg9[%c0_11, %c0_12] : memref<16x32xf32, #tpu.memory_space<vmem>>, vector<16x32xf32>
      tpu.vector_store %arg9[%c0_11, %c0_12], %14 {strides = array<i32>} : memref<16x32xf32, #tpu.memory_space<vmem>>, vector<16x32xf32>,
    } else {
    }
    %c0 = arith.constant 0 : index
    %c0_1 = arith.constant 0 : index
    %3 = vector.load %arg9[%c0, %c0_1] : memref<16x32xf32, #tpu.memory_space<vmem>>, vector<16x32xf32>
    %c0_2 = arith.constant 0 : index
    %c0_3 = arith.constant 0 : index
    %4 = vector.load %arg2[%c0_2, %c0_3] : memref<16x64xf32, #tpu.memory_space<vmem>>, vector<16x64xf32>
    %5 = arith.truncf %4 : vector<16x64xf32> to vector<16x64xbf16>
    %c0_4 = arith.constant 0 : index
    %c0_5 = arith.constant 0 : index
    %6 = vector.load %arg3[%c0_4, %c0_5] : memref<64x32xf32, #tpu.memory_space<vmem>>, vector<64x32xf32>
    %7 = arith.truncf %6 : vector<64x32xf32> to vector<64x32xbf16>
    %cst = arith.constant dense<0.000000e+00> : vector<16x32xf32>
    %8 = tpu.matmul %5, %7, %cst {dimension_numbers = #tpu.dot_dimension_numbers<[1], [0], [0], [1], [0, 0, 1, 1], [], []>} : vector<16x64xbf16>, vector<64x32xbf16>, vector<16x32xf32> -> vector<16x32xf32>
    %9 = arith.addf %3, %8 : vector<16x32xf32>
    %c0_6 = arith.constant 0 : index
    %c0_7 = arith.constant 0 : index
    %10 = vector.load %arg9[%c0_6, %c0_7] : memref<16x32xf32, #tpu.memory_space<vmem>>, vector<16x32xf32>
    tpu.vector_store %arg9[%c0_6, %c0_7], %9 {strides = array<i32>} : memref<16x32xf32, #tpu.memory_space<vmem>>, vector<16x32xf32>,
    %c0_i32_8 = arith.constant 0 : i32
    %11 = arith.cmpi eq, %arg1, %c0_i32_8 : i32
    %12 = arith.extui %11 : i1 to i32
    %c0_i32_9 = arith.constant 0 : i32
    %13 = arith.cmpi ne, %12, %c0_i32_9 : i32
    scf.if %13 {
      %c0_10 = arith.constant 0 : index
      %c0_11 = arith.constant 0 : index
      %14 = vector.load %arg9[%c0_10, %c0_11] : memref<16x32xf32, #tpu.memory_space<vmem>>, vector<16x32xf32>
      %c0_12 = arith.constant 0 : index
      %c0_13 = arith.constant 0 : index
      %15 = vector.load %arg4[%c0_12, %c0_13] : memref<1x32xf32, #tpu.memory_space<vmem>>, vector<1x32xf32>
      %16 = vector.broadcast %15 : vector<1x32xf32> to vector<16x32xf32>
      %17 = arith.addf %14, %16 : vector<16x32xf32>
      %c0_14 = arith.constant 0 : index
      %c0_15 = arith.constant 0 : index
      %18 = vector.load %arg5[%c0_14, %c0_15] : memref<16x32xf32, #tpu.memory_space<vmem>>, vector<16x32xf32>
      %19 = arith.addf %17, %18 : vector<16x32xf32>
      %cst_16 = arith.constant dense<0.000000e+00> : vector<16xf32>
      %20 = vector.multi_reduction <add>, %19, %cst_16 [1] : vector<16x32xf32> to vector<16xf32>
      %21 = vector.shape_cast %20 : vector<16xf32> to vector<16x1xf32>
      %cst_17 = arith.constant 3.200000e+01 : f32
      %22 = vector.broadcast %cst_17 : f32 to vector<16x1xf32>
      %23 = arith.divf %21, %22 : vector<16x1xf32>
      %24 = vector.broadcast %23 : vector<16x1xf32> to vector<16x32xf32>
      %25 = arith.subf %19, %24 : vector<16x32xf32>
      %26 = arith.mulf %25, %25 : vector<16x32xf32>
      %cst_18 = arith.constant dense<0.000000e+00> : vector<16xf32>
      %27 = vector.multi_reduction <add>, %26, %cst_18 [1] : vector<16x32xf32> to vector<16xf32>
      %28 = vector.shape_cast %27 : vector<16xf32> to vector<16x1xf32>
      %cst_19 = arith.constant 3.200000e+01 : f32
      %29 = vector.broadcast %cst_19 : f32 to vector<16x1xf32>
      %30 = arith.divf %28, %29 : vector<16x1xf32>
      %cst_20 = arith.constant 9.99999974E-6 : f32
      %31 = vector.broadcast %cst_20 : f32 to vector<16x1xf32>
      %32 = arith.addf %30, %31 : vector<16x1xf32>
      %33 = math.rsqrt %32 : vector<16x1xf32>
      %34 = vector.broadcast %23 : vector<16x1xf32> to vector<16x32xf32>
      %35 = arith.subf %19, %34 : vector<16x32xf32>
      %36 = vector.broadcast %33 : vector<16x1xf32> to vector<16x32xf32>
      %37 = arith.mulf %35, %36 : vector<16x32xf32>
      %c0_21 = arith.constant 0 : index
      %c0_22 = arith.constant 0 : index
      %38 = vector.load %arg6[%c0_21, %c0_22] : memref<1x32xf32, #tpu.memory_space<vmem>>, vector<1x32xf32>
      %39 = vector.broadcast %38 : vector<1x32xf32> to vector<16x32xf32>
      %40 = arith.mulf %37, %39 : vector<16x32xf32>
      %c0_23 = arith.constant 0 : index
      %c0_24 = arith.constant 0 : index
      %41 = vector.load %arg7[%c0_23, %c0_24] : memref<1x32xf32, #tpu.memory_space<vmem>>, vector<1x32xf32>
      %42 = vector.broadcast %41 : vector<1x32xf32> to vector<16x32xf32>
      %43 = arith.addf %40, %42 : vector<16x32xf32>
      %c0_25 = arith.constant 0 : index
      %c0_26 = arith.constant 0 : index
      %44 = vector.load %arg8[%c0_25, %c0_26] : memref<16x32xf32, #tpu.memory_space<vmem>>, vector<16x32xf32>
      tpu.vector_store %arg8[%c0_25, %c0_26], %43 {strides = array<i32>} : memref<16x32xf32, #tpu.memory_space<vmem>>, vector<16x32xf32>,
    } else {
    }
    return
  }
  func.func @transform_0(%arg0: i32, %arg1: i32) -> (i32, i32) {
    %c0_i32 = arith.constant 0 : i32
    return %arg0, %arg1 : i32, i32
  }
  func.func @transform_1(%arg0: i32, %arg1: i32) -> (i32, i32) {
    %c0_i32 = arith.constant 0 : i32
    %c0_i32_0 = arith.constant 0 : i32
    return %arg1, %c0_i32 : i32, i32
  }
  func.func @transform_2(%arg0: i32, %arg1: i32) -> (i32, i32) {
    %c0_i32 = arith.constant 0 : i32
    %c0_i32_0 = arith.constant 0 : i32
    %c0_i32_1 = arith.constant 0 : i32
    return %c0_i32, %c0_i32_0 : i32, i32
  }
  func.func @transform_3(%arg0: i32, %arg1: i32) -> (i32, i32) {
    %c0_i32 = arith.constant 0 : i32
    %c0_i32_0 = arith.constant 0 : i32
    return %arg0, %c0_i32 : i32, i32
  }
  func.func @transform_4(%arg0: i32, %arg1: i32) -> (i32, i32) {
    %c0_i32 = arith.constant 0 : i32
    %c0_i32_0 = arith.constant 0 : i32
    %c0_i32_1 = arith.constant 0 : i32
    return %c0_i32, %c0_i32_0 : i32, i32
  }
  func.func @transform_5(%arg0: i32, %arg1: i32) -> (i32, i32) {
    %c0_i32 = arith.constant 0 : i32
    %c0_i32_0 = arith.constant 0 : i32
    %c0_i32_1 = arith.constant 0 : i32
    return %c0_i32, %c0_i32_0 : i32, i32
  }
  func.func @transform_6(%arg0: i32, %arg1: i32) -> (i32, i32) {
    %c0_i32 = arith.constant 0 : i32
    %c0_i32_0 = arith.constant 0 : i32
    return %arg0, %c0_i32 : i32, i32
  }
}

module attributes {stable_mosaic.version = 11 : i64} {
  func.func @kernel(%arg0: i32, %arg1: i32, %arg2: i32, %arg3: memref<2x32xf32, #tpu.memory_space<vmem>>, %arg4: memref<32x32xf32, #tpu.memory_space<vmem>>, %arg5: memref<1x32xf32, #tpu.memory_space<vmem>>, %arg6: memref<2x32xf32, #tpu.memory_space<vmem>>, %arg7: memref<2x32xf32, #tpu.memory_space<vmem>>) attributes {dimension_semantics = [#tpu.dimension_semantics<parallel>, #tpu.dimension_semantics<parallel>, #tpu.dimension_semantics<arbitrary>], iteration_bounds = array<i64: 1, 1, 1>, scalar_prefetch = 0 : i64, scratch_operands = 1 : i64, tpu.core_type = #tpu.core_type<tc>, window_params = [{transform_indices = @transform_0, window_bounds = array<i64: 2, 32>}, {transform_indices = @transform_1, window_bounds = array<i64: 32, 32>}, {transform_indices = @transform_2, window_bounds = array<i64: 1, 32>}, {transform_indices = @transform_3, window_bounds = array<i64: 2, 32>}]} {
    %c0_i32 = arith.constant 0 : i32
    %0 = arith.cmpi eq, %arg2, %c0_i32 : i32
    %1 = arith.extui %0 : i1 to i32
    %c0_i32_0 = arith.constant 0 : i32
    %2 = arith.cmpi ne, %1, %c0_i32_0 : i32
    scf.if %2 {
      %cst_10 = arith.constant 0.000000e+00 : f32
      %14 = vector.broadcast %cst_10 : f32 to vector<2x32xf32>
      %c0_11 = arith.constant 0 : index
      %c0_12 = arith.constant 0 : index
      %15 = vector.load %arg7[%c0_11, %c0_12] : memref<2x32xf32, #tpu.memory_space<vmem>>, vector<2x32xf32>
      tpu.vector_store %arg7[%c0_11, %c0_12], %14 {strides = array<i32>} : memref<2x32xf32, #tpu.memory_space<vmem>>, vector<2x32xf32>,
    } else {
    }
    %c0 = arith.constant 0 : index
    %c0_1 = arith.constant 0 : index
    %3 = vector.load %arg7[%c0, %c0_1] : memref<2x32xf32, #tpu.memory_space<vmem>>, vector<2x32xf32>
    %c0_2 = arith.constant 0 : index
    %c0_3 = arith.constant 0 : index
    %4 = vector.load %arg3[%c0_2, %c0_3] : memref<2x32xf32, #tpu.memory_space<vmem>>, vector<2x32xf32>
    %5 = arith.truncf %4 : vector<2x32xf32> to vector<2x32xbf16>
    %c0_4 = arith.constant 0 : index
    %c0_5 = arith.constant 0 : index
    %6 = vector.load %arg4[%c0_4, %c0_5] : memref<32x32xf32, #tpu.memory_space<vmem>>, vector<32x32xf32>
    %7 = arith.truncf %6 : vector<32x32xf32> to vector<32x32xbf16>
    %cst = arith.constant dense<0.000000e+00> : vector<2x32xf32>
    %8 = tpu.matmul %5, %7, %cst {dimension_numbers = #tpu.dot_dimension_numbers<[1], [0], [0], [1], [0, 0, 1, 1], [], []>} : vector<2x32xbf16>, vector<32x32xbf16>, vector<2x32xf32> -> vector<2x32xf32>
    %9 = arith.addf %3, %8 : vector<2x32xf32>
    %c0_6 = arith.constant 0 : index
    %c0_7 = arith.constant 0 : index
    %10 = vector.load %arg7[%c0_6, %c0_7] : memref<2x32xf32, #tpu.memory_space<vmem>>, vector<2x32xf32>
    tpu.vector_store %arg7[%c0_6, %c0_7], %9 {strides = array<i32>} : memref<2x32xf32, #tpu.memory_space<vmem>>, vector<2x32xf32>,
    %c0_i32_8 = arith.constant 0 : i32
    %11 = arith.cmpi eq, %arg2, %c0_i32_8 : i32
    %12 = arith.extui %11 : i1 to i32
    %c0_i32_9 = arith.constant 0 : i32
    %13 = arith.cmpi ne, %12, %c0_i32_9 : i32
    scf.if %13 {
      %c0_10 = arith.constant 0 : index
      %c0_11 = arith.constant 0 : index
      %14 = vector.load %arg7[%c0_10, %c0_11] : memref<2x32xf32, #tpu.memory_space<vmem>>, vector<2x32xf32>
      %c0_12 = arith.constant 0 : index
      %c0_13 = arith.constant 0 : index
      %15 = vector.load %arg5[%c0_12, %c0_13] : memref<1x32xf32, #tpu.memory_space<vmem>>, vector<1x32xf32>
      %16 = vector.broadcast %15 : vector<1x32xf32> to vector<2x32xf32>
      %17 = arith.addf %14, %16 : vector<2x32xf32>
      %18 = math.tanh %17 : vector<2x32xf32>
      %c0_14 = arith.constant 0 : index
      %c0_15 = arith.constant 0 : index
      %19 = vector.load %arg6[%c0_14, %c0_15] : memref<2x32xf32, #tpu.memory_space<vmem>>, vector<2x32xf32>
      tpu.vector_store %arg6[%c0_14, %c0_15], %18 {strides = array<i32>} : memref<2x32xf32, #tpu.memory_space<vmem>>, vector<2x32xf32>,
    } else {
    }
    return
  }
  func.func @transform_0(%arg0: i32, %arg1: i32, %arg2: i32) -> (i32, i32) {
    %c0_i32 = arith.constant 0 : i32
    return %arg0, %arg2 : i32, i32
  }
  func.func @transform_1(%arg0: i32, %arg1: i32, %arg2: i32) -> (i32, i32) {
    %c0_i32 = arith.constant 0 : i32
    return %arg2, %arg1 : i32, i32
  }
  func.func @transform_2(%arg0: i32, %arg1: i32, %arg2: i32) -> (i32, i32) {
    %c0_i32 = arith.constant 0 : i32
    %c0_i32_0 = arith.constant 0 : i32
    return %c0_i32, %arg1 : i32, i32
  }
  func.func @transform_3(%arg0: i32, %arg1: i32, %arg2: i32) -> (i32, i32) {
    %c0_i32 = arith.constant 0 : i32
    return %arg0, %arg1 : i32, i32
  }
}

module attributes {stable_mosaic.version = 11 : i64} {
  func.func @kernel(%arg0: i32, %arg1: i32, %arg2: i32, %arg3: memref<2x32xf32, #tpu.memory_space<vmem>>, %arg4: memref<32x2xf32, #tpu.memory_space<vmem>>, %arg5: memref<2x2xf32, #tpu.memory_space<vmem>>, %arg6: memref<2x2xf32, #tpu.memory_space<vmem>>) attributes {dimension_semantics = [#tpu.dimension_semantics<parallel>, #tpu.dimension_semantics<parallel>, #tpu.dimension_semantics<arbitrary>], iteration_bounds = array<i64: 1, 1, 1>, scalar_prefetch = 0 : i64, scratch_operands = 1 : i64, tpu.core_type = #tpu.core_type<tc>, window_params = [{transform_indices = @transform_0, window_bounds = array<i64: 2, 32>}, {transform_indices = @transform_1, window_bounds = array<i64: 32, 2>}, {transform_indices = @transform_2, window_bounds = array<i64: 2, 2>}]} {
    %c0_i32 = arith.constant 0 : i32
    %0 = arith.cmpi eq, %arg2, %c0_i32 : i32
    %1 = arith.extui %0 : i1 to i32
    %c0_i32_0 = arith.constant 0 : i32
    %2 = arith.cmpi ne, %1, %c0_i32_0 : i32
    scf.if %2 {
      %cst_10 = arith.constant 0.000000e+00 : f32
      %14 = vector.broadcast %cst_10 : f32 to vector<2x2xf32>
      %c0_11 = arith.constant 0 : index
      %c0_12 = arith.constant 0 : index
      %15 = vector.load %arg6[%c0_11, %c0_12] : memref<2x2xf32, #tpu.memory_space<vmem>>, vector<2x2xf32>
      tpu.vector_store %arg6[%c0_11, %c0_12], %14 {strides = array<i32>} : memref<2x2xf32, #tpu.memory_space<vmem>>, vector<2x2xf32>,
    } else {
    }
    %c0 = arith.constant 0 : index
    %c0_1 = arith.constant 0 : index
    %3 = vector.load %arg6[%c0, %c0_1] : memref<2x2xf32, #tpu.memory_space<vmem>>, vector<2x2xf32>
    %c0_2 = arith.constant 0 : index
    %c0_3 = arith.constant 0 : index
    %4 = vector.load %arg3[%c0_2, %c0_3] : memref<2x32xf32, #tpu.memory_space<vmem>>, vector<2x32xf32>
    %5 = arith.truncf %4 : vector<2x32xf32> to vector<2x32xbf16>
    %c0_4 = arith.constant 0 : index
    %c0_5 = arith.constant 0 : index
    %6 = vector.load %arg4[%c0_4, %c0_5] : memref<32x2xf32, #tpu.memory_space<vmem>>, vector<32x2xf32>
    %7 = arith.truncf %6 : vector<32x2xf32> to vector<32x2xbf16>
    %cst = arith.constant dense<0.000000e+00> : vector<2x2xf32>
    %8 = tpu.matmul %5, %7, %cst {dimension_numbers = #tpu.dot_dimension_numbers<[1], [0], [0], [1], [0, 0, 1, 1], [], []>} : vector<2x32xbf16>, vector<32x2xbf16>, vector<2x2xf32> -> vector<2x2xf32>
    %9 = arith.addf %3, %8 : vector<2x2xf32>
    %c0_6 = arith.constant 0 : index
    %c0_7 = arith.constant 0 : index
    %10 = vector.load %arg6[%c0_6, %c0_7] : memref<2x2xf32, #tpu.memory_space<vmem>>, vector<2x2xf32>
    tpu.vector_store %arg6[%c0_6, %c0_7], %9 {strides = array<i32>} : memref<2x2xf32, #tpu.memory_space<vmem>>, vector<2x2xf32>,
    %c0_i32_8 = arith.constant 0 : i32
    %11 = arith.cmpi eq, %arg2, %c0_i32_8 : i32
    %12 = arith.extui %11 : i1 to i32
    %c0_i32_9 = arith.constant 0 : i32
    %13 = arith.cmpi ne, %12, %c0_i32_9 : i32
    scf.if %13 {
      %c0_10 = arith.constant 0 : index
      %c0_11 = arith.constant 0 : index
      %14 = vector.load %arg6[%c0_10, %c0_11] : memref<2x2xf32, #tpu.memory_space<vmem>>, vector<2x2xf32>
      %c0_12 = arith.constant 0 : index
      %c0_13 = arith.constant 0 : index
      %15 = vector.load %arg5[%c0_12, %c0_13] : memref<2x2xf32, #tpu.memory_space<vmem>>, vector<2x2xf32>
      tpu.vector_store %arg5[%c0_12, %c0_13], %14 {strides = array<i32>} : memref<2x2xf32, #tpu.memory_space<vmem>>, vector<2x2xf32>,
    } else {
    }
    return
  }
  func.func @transform_0(%arg0: i32, %arg1: i32, %arg2: i32) -> (i32, i32) {
    %c0_i32 = arith.constant 0 : i32
    return %arg0, %arg2 : i32, i32
  }
  func.func @transform_1(%arg0: i32, %arg1: i32, %arg2: i32) -> (i32, i32) {
    %c0_i32 = arith.constant 0 : i32
    return %arg2, %arg1 : i32, i32
  }
  func.func @transform_2(%arg0: i32, %arg1: i32, %arg2: i32) -> (i32, i32) {
    %c0_i32 = arith.constant 0 : i32
    return %arg0, %arg1 : i32, i32
  }
}

module attributes {stable_mosaic.version = 11 : i64} {
  func.func @kernel(%arg0: i32, %arg1: i32, %arg2: i32, %arg3: memref<16x32xf32, #tpu.memory_space<vmem>>, %arg4: memref<32x128xf32, #tpu.memory_space<vmem>>, %arg5: memref<16x128xf32, #tpu.memory_space<vmem>>, %arg6: memref<16x128xf32, #tpu.memory_space<vmem>>) attributes {dimension_semantics = [#tpu.dimension_semantics<parallel>, #tpu.dimension_semantics<parallel>, #tpu.dimension_semantics<arbitrary>], iteration_bounds = array<i64: 1, 1, 1>, scalar_prefetch = 0 : i64, scratch_operands = 1 : i64, tpu.core_type = #tpu.core_type<tc>, window_params = [{transform_indices = @transform_0, window_bounds = array<i64: 16, 32>}, {transform_indices = @transform_1, window_bounds = array<i64: 32, 128>}, {transform_indices = @transform_2, window_bounds = array<i64: 16, 128>}]} {
    %c0_i32 = arith.constant 0 : i32
    %0 = arith.cmpi eq, %arg2, %c0_i32 : i32
    %1 = arith.extui %0 : i1 to i32
    %c0_i32_0 = arith.constant 0 : i32
    %2 = arith.cmpi ne, %1, %c0_i32_0 : i32
    scf.if %2 {
      %cst_10 = arith.constant 0.000000e+00 : f32
      %14 = vector.broadcast %cst_10 : f32 to vector<16x128xf32>
      %c0_11 = arith.constant 0 : index
      %c0_12 = arith.constant 0 : index
      %15 = vector.load %arg6[%c0_11, %c0_12] : memref<16x128xf32, #tpu.memory_space<vmem>>, vector<16x128xf32>
      tpu.vector_store %arg6[%c0_11, %c0_12], %14 {strides = array<i32>} : memref<16x128xf32, #tpu.memory_space<vmem>>, vector<16x128xf32>,
    } else {
    }
    %c0 = arith.constant 0 : index
    %c0_1 = arith.constant 0 : index
    %3 = vector.load %arg6[%c0, %c0_1] : memref<16x128xf32, #tpu.memory_space<vmem>>, vector<16x128xf32>
    %c0_2 = arith.constant 0 : index
    %c0_3 = arith.constant 0 : index
    %4 = vector.load %arg3[%c0_2, %c0_3] : memref<16x32xf32, #tpu.memory_space<vmem>>, vector<16x32xf32>
    %5 = arith.truncf %4 : vector<16x32xf32> to vector<16x32xbf16>
    %c0_4 = arith.constant 0 : index
    %c0_5 = arith.constant 0 : index
    %6 = vector.load %arg4[%c0_4, %c0_5] : memref<32x128xf32, #tpu.memory_space<vmem>>, vector<32x128xf32>
    %7 = arith.truncf %6 : vector<32x128xf32> to vector<32x128xbf16>
    %cst = arith.constant dense<0.000000e+00> : vector<16x128xf32>
    %8 = tpu.matmul %5, %7, %cst {dimension_numbers = #tpu.dot_dimension_numbers<[1], [0], [0], [1], [0, 0, 1, 1], [], []>} : vector<16x32xbf16>, vector<32x128xbf16>, vector<16x128xf32> -> vector<16x128xf32>
    %9 = arith.addf %3, %8 : vector<16x128xf32>
    %c0_6 = arith.constant 0 : index
    %c0_7 = arith.constant 0 : index
    %10 = vector.load %arg6[%c0_6, %c0_7] : memref<16x128xf32, #tpu.memory_space<vmem>>, vector<16x128xf32>
    tpu.vector_store %arg6[%c0_6, %c0_7], %9 {strides = array<i32>} : memref<16x128xf32, #tpu.memory_space<vmem>>, vector<16x128xf32>,
    %c0_i32_8 = arith.constant 0 : i32
    %11 = arith.cmpi eq, %arg2, %c0_i32_8 : i32
    %12 = arith.extui %11 : i1 to i32
    %c0_i32_9 = arith.constant 0 : i32
    %13 = arith.cmpi ne, %12, %c0_i32_9 : i32
    scf.if %13 {
      %c0_10 = arith.constant 0 : index
      %c0_11 = arith.constant 0 : index
      %14 = vector.load %arg6[%c0_10, %c0_11] : memref<16x128xf32, #tpu.memory_space<vmem>>, vector<16x128xf32>
      %c0_12 = arith.constant 0 : index
      %c0_13 = arith.constant 0 : index
      %15 = vector.load %arg5[%c0_12, %c0_13] : memref<16x128xf32, #tpu.memory_space<vmem>>, vector<16x128xf32>
      tpu.vector_store %arg5[%c0_12, %c0_13], %14 {strides = array<i32>} : memref<16x128xf32, #tpu.memory_space<vmem>>, vector<16x128xf32>,
    } else {
    }
    return
  }
  func.func @transform_0(%arg0: i32, %arg1: i32, %arg2: i32) -> (i32, i32) {
    %c0_i32 = arith.constant 0 : i32
    return %arg0, %arg2 : i32, i32
  }
  func.func @transform_1(%arg0: i32, %arg1: i32, %arg2: i32) -> (i32, i32) {
    %c0_i32 = arith.constant 0 : i32
    return %arg2, %arg1 : i32, i32
  }
  func.func @transform_2(%arg0: i32, %arg1: i32, %arg2: i32) -> (i32, i32) {
    %c0_i32 = arith.constant 0 : i32
    return %arg0, %arg1 : i32, i32
  }
}

</mosaic_0001>

<bundles_post_ra>
// kernel: bert_pretrain_forward.15
= control target key start
LH: loop header
LB: loop body
LE: loop exit
PB: predicated region body
PF: predicated region fallthrough
CT: control target
= control target key end

     0   :  { %vm28_vm0 = vcmask 261120   ;;  %v181_v0 = vmov 0.0   ;;  %vm182_vm1 = vmmov 0   ;;  %s268_s1 = inlined_call_operand.vmem [shape: f32[32,32], index: 1, kind: input, shape index: {}]   ;;  %s269_s0 = inlined_call_operand.vmem [shape: f32[16,32], index: 0, kind: input, shape index: {}]   ;;  %s270_s2 = inlined_call_operand.vmem [shape: f32[1,32], index: 2, kind: input, shape index: {}]   ;;  %s271_s3 = inlined_call_operand.vmem [shape: f32[16,32], index: 3, kind: input, shape index: {}]   ;;  %s272_s4 = inlined_call_operand.vmem [shape: f32[1,32], index: 4, kind: input, shape index: {}]   ;;  %s273_s5 = inlined_call_operand.vmem [shape: f32[1,32], index: 5, kind: input, shape index: {}]   ;;  %s274_s6 = inlined_call_operand.vmem [shape: f32[16,32], index: 6, kind: output, shape index: {}]  }
   0x1   :  { %167 = vmatprep.subr.bf16.mxu0 %v181_v0  ;;  %v36_v1 = vld [vmem:[%s268_s1] sm:$0xff]  ;;  %v37_v2 = vld [vmem:[%s268_s1 + $0x8] sm:$0xff]  ;;  %v38_v3 = vld [vmem:[%s268_s1 + $0x10] sm:$0xff]  ;;  %171 = vmatprep.mubr.msk.bf16.mxu0 %vm182_vm1, %v181_v0  ;;  %29 = vst.msk [vmem:[#allocation2] sm:$0xff] %vm28_vm0, %v181_v0 }
   0x2   :  { %30 = vst.msk [vmem:[#allocation2 + $0x8] sm:$0xff] %vm28_vm0, %v181_v0  ;;  %v40_v4 = vpack.c.bf16 %v37_v2, %v36_v1  ;;  %v39_v5 = vld [vmem:[%s268_s1 + $0x18] sm:$0xff]  ;;  %v33_v7 = vld [vmem:[%s269_s0] sm:$0xff]  ;;  %v34_v8 = vld [vmem:[%s269_s0 + $0x8] sm:$0xff] }
   0x3   :  { %v41_v6 = vpack.c.bf16 %v39_v5, %v38_v3  ;;  %v35_v9 = vpack.c.bf16 %v34_v8, %v33_v7  ;;  %v161_v18 = vld [vmem:[%s270_s2] ss:$0 sm:$0xff]  ;;  %v106_v23 = vld [vmem:[%s271_s3 + $0x8] sm:$0xff] }
   0x4   :  { %168 = vmatpush3.bf16.msra.mxu0 %v40_v4  ;;  %v105_v20 = vld [vmem:[%s271_s3] sm:$0xff] }
   0x5   :  { %169 = vmatprep.subr.bf16.mxu0 %v181_v0  ;;  %v162_v46 = vld [vmem:[%s272_s4] ss:$0 sm:$0xff] }
   0x6   :  { %v163_v48 = vld [vmem:[%s273_s5] ss:$0 sm:$0xff] }
   0x8   :  { %170 = vmatpush3.bf16.msra.mxu0 %v41_v6  ;;  %v31_v10 = vld [vmem:[#allocation2] sm:$0xff] }
   0x9   :  { %v32_v12 = vld [vmem:[#allocation2 + $0x8] sm:$0xff] }
   0xb   :  { %172 = vmatmul.mubr.msk.bf16.vlgmr.msra.gmra.mrb[0].mxu0 %vm28_vm0, %v35_v9 }
  0xde   :  { %v80_v11 = vpop.f32.mrb[0].mxu0 }
  0xdf   :  { %v87_v13 = vadd.f32 %v80_v11, %v31_v10  ;;  %v173_v14 = vpop.f32.mrb[1].mxu0 }
  0xe0   :  { %v83_v15 = vpop.f32.mrb[2].mxu0 }
  0xe1   :  { %89 = vst.msk [vmem:[#allocation2] sm:$0xff] %vm28_vm0, %v87_v13  ;;  %v88_v16 = vadd.f32 %v83_v15, %v32_v12  ;;  %v174_v17 = vpop.f32.mrb[3].mxu0 }
  0xe3   :  { %90 = vst.msk [vmem:[#allocation2 + $0x8] sm:$0xff] %vm28_vm0, %v88_v16 }
  0xe8   :  { %v94_v19 = vld [vmem:[#allocation2] sm:$0xff] }
  0xe9   :  { %v103_v21 = vadd.f32 %v161_v18, %v94_v19 }
  0xea   :  { %v95_v22 = vld [vmem:[#allocation2 + $0x8] sm:$0xff] }
  0xeb   :  { %v107_v24 = vadd.f32 %v105_v20, %v103_v21  ;;  %v104_v25 = vadd.f32 %v161_v18, %v95_v22 }
  0xed   :  { %v109_v26 = vsel %vm28_vm0, %v107_v24, 0.0  ;;  %v108_v27 = vadd.f32 %v106_v23, %v104_v25 }
  0xee   :  { %110 = vadd.xlane.f32.xlu0 %v109_v26 }
  0xef   :  { %v112_v28 = vsel %vm28_vm0, %v108_v27, 0.0 }
  0xf2   :  { %113 = vadd.xlane.f32.xlu0 %v112_v28 }
 0x17b   :  { %v111_v29 = vpop.xlane.xlu0 %110 }
 0x17c   :  { %v116_v30 = vmul.f32 0.03125, %v111_v29 }
 0x17e   :  { %v118_v31 = vsub.f32 %v107_v24, %v116_v30 }
 0x17f   :  { %v114_v32 = vpop.xlane.xlu0 %113 }
 0x180   :  { %v117_v33 = vmul.f32 0.03125, %v114_v32  ;;  %v120_v34 = vmul.f32 %v118_v31, %v118_v31 }
 0x182   :  { %v119_v35 = vsub.f32 %v108_v27, %v117_v33  ;;  %v122_v36 = vsel %vm28_vm0, %v120_v34, 0.0 }
 0x183   :  { %123 = vadd.xlane.f32.xlu1 %v122_v36 }
 0x184   :  { %v121_v37 = vmul.f32 %v119_v35, %v119_v35 }
 0x186   :  { %v125_v38 = vsel %vm28_vm0, %v121_v37, 0.0 }
 0x187   :  { %126 = vadd.xlane.f32.xlu1 %v125_v38 }
 0x210   :  { %v124_v39 = vpop.xlane.xlu1 %123 }
 0x211   :  { %v128_v40 = vmul.f32 0.03125, %v124_v39 }
 0x213   :  { %v130_v41 = vadd.f32 1e-05, %v128_v40 }
 0x214   :  { %v127_v42 = vpop.xlane.xlu1 %126 }
 0x215   :  { %177 = vrsqrt.f32 %v130_v41  ;;  %v129_v43 = vmul.f32 0.03125, %v127_v42 }
 0x217   :  { %v131_v44 = vadd.f32 1e-05, %v129_v43 }
 0x219   :  { %179 = vrsqrt.f32 %v131_v44 }
 0x21f   :  { %v178_v45 = vpop.eup %177 }
 0x220   :  { %v134_v47 = vmul.f32 %v178_v45, %v118_v31 }
 0x222   :  { %v143_v49 = vmul.f32 %v162_v46, %v134_v47 }
 0x223   :  { %v180_v50 = vpop.eup %179 }
 0x224   :  { %v152_v51 = vadd.f32 %v163_v48, %v143_v49  ;;  %v135_v52 = vmul.f32 %v180_v50, %v119_v35 }
 0x226   :  { %154 = vst.msk [vmem:[%s274_s6] sm:$0xff] %vm28_vm0, %v152_v51  ;;  %v144_v53 = vmul.f32 %v162_v46, %v135_v52 }
 0x228   :  { %v153_v54 = vadd.f32 %v163_v48, %v144_v53 }
 0x22a   :  { %155 = vst.msk [vmem:[%s274_s6 + $0x8] sm:$0xff] %vm28_vm0, %v153_v54 }

// kernel: bert_pretrain_forward.13
= control target key start
LH: loop header
LB: loop body
LE: loop exit
PB: predicated region body
PF: predicated region fallthrough
CT: control target
= control target key end

     0   :  { %vm19_vm0 = vcmask 785408   ;;  %v118_v0 = vmov 0.0   ;;  %vm119_vm1 = vmmov 0   ;;  %vm33_vm2 = vcmask 261120   ;;  %s173_s1 = inlined_call_operand.vmem [shape: f32[32,96], index: 1, kind: input, shape index: {}]   ;;  %s174_s0 = inlined_call_operand.vmem [shape: f32[16,32], index: 0, kind: input, shape index: {}]   ;;  %s175_s2 = inlined_call_operand.vmem [shape: f32[1,96], index: 2, kind: input, shape index: {}]   ;;  %s176_s3 = inlined_call_operand.vmem [shape: f32[16,96], index: 3, kind: output, shape index: {}]  }
   0x1   :  { %108 = vmatprep.subr.bf16.mxu0 %v118_v0  ;;  %v27_v1 = vld [vmem:[%s173_s1] sm:$0xff]  ;;  %v28_v2 = vld [vmem:[%s173_s1 + $0x8] sm:$0xff]  ;;  %v29_v3 = vld [vmem:[%s173_s1 + $0x10] sm:$0xff]  ;;  %112 = vmatprep.mubr.msk.bf16.mxu0 %vm119_vm1, %v118_v0  ;;  %20 = vst.msk [vmem:[#allocation2] sm:$0xff] %vm19_vm0, %v118_v0 }
   0x2   :  { %21 = vst.msk [vmem:[#allocation2 + $0x8] sm:$0xff] %vm19_vm0, %v118_v0  ;;  %v31_v4 = vpack.c.bf16 %v28_v2, %v27_v1  ;;  %v30_v5 = vld [vmem:[%s173_s1 + $0x18] sm:$0xff]  ;;  %v24_v7 = vld [vmem:[%s174_s0] sm:$0xff]  ;;  %v25_v8 = vld [vmem:[%s174_s0 + $0x8] sm:$0xff] }
   0x3   :  { %v32_v6 = vpack.c.bf16 %v30_v5, %v29_v3  ;;  %v26_v9 = vpack.c.bf16 %v25_v8, %v24_v7  ;;  %v104_v18 = vld [vmem:[%s175_s2] ss:$0 sm:$0xff] }
   0x4   :  { %109 = vmatpush3.bf16.msra.mxu0 %v31_v4 }
   0x5   :  { %110 = vmatprep.subr.bf16.mxu0 %v118_v0 }
   0x8   :  { %111 = vmatpush3.bf16.msra.mxu0 %v32_v6  ;;  %v22_v10 = vld [vmem:[#allocation2] sm:$0xff] }
   0x9   :  { %v23_v12 = vld [vmem:[#allocation2 + $0x8] sm:$0xff] }
   0xb   :  { %113 = vmatmul.mubr.msk.bf16.vlgmr.msra.gmra.mrb[0].mxu0 %vm33_vm2, %v26_v9 }
  0xde   :  { %v71_v11 = vpop.f32.mrb[0].mxu0 }
  0xdf   :  { %v78_v13 = vadd.f32 %v71_v11, %v22_v10  ;;  %v114_v14 = vpop.f32.mrb[1].mxu0 }
  0xe0   :  { %v74_v15 = vpop.f32.mrb[2].mxu0 }
  0xe1   :  { %81 = vst.msk [vmem:[#allocation2] sm:$0xff] %vm19_vm0, %v78_v13  ;;  %v79_v16 = vadd.f32 %v74_v15, %v23_v12  ;;  %v115_v17 = vpop.f32.mrb[3].mxu0 }
  0xe3   :  { %82 = vst.msk [vmem:[#allocation2 + $0x8] sm:$0xff] %vm19_vm0, %v79_v16 }
  0xe8   :  { %v86_v19 = vld [vmem:[#allocation2] sm:$0xff] }
  0xe9   :  { %v95_v20 = vadd.f32 %v104_v18, %v86_v19 }
  0xea   :  { %v87_v21 = vld [vmem:[#allocation2 + $0x8] sm:$0xff] }
  0xeb   :  { %97 = vst.msk [vmem:[%s176_s3] sm:$0xff] %vm19_vm0, %v95_v20  ;;  %v96_v22 = vadd.f32 %v104_v18, %v87_v21 }
  0xed   :  { %98 = vst.msk [vmem:[%s176_s3 + $0x8] sm:$0xff] %vm19_vm0, %v96_v22 }

// kernel: bert_pretrain_forward.16
= control target key start
LH: loop header
LB: loop body
LE: loop exit
PB: predicated region body
PF: predicated region fallthrough
CT: control target
= control target key end

     0   :  { %vm19_vm0 = vcmask 523264   ;;  %v140_v0 = vmov 0.0   ;;  %vm141_vm1 = vmmov 0   ;;  %vm33_vm2 = vcmask 261120   ;;  %s195_s1 = inlined_call_operand.vmem [shape: f32[32,64], index: 1, kind: input, shape index: {}]   ;;  %s196_s0 = inlined_call_operand.vmem [shape: f32[16,32], index: 0, kind: input, shape index: {}]   ;;  %s197_s2 = inlined_call_operand.vmem [shape: f32[1,64], index: 2, kind: input, shape index: {}]   ;;  %s198_s3 = inlined_call_operand.vmem [shape: f32[16,64], index: 3, kind: output, shape index: {}]  }
   0x1   :  { %126 = vmatprep.subr.bf16.mxu0 %v140_v0  ;;  %v27_v1 = vld [vmem:[%s195_s1] sm:$0xff]  ;;  %v28_v2 = vld [vmem:[%s195_s1 + $0x8] sm:$0xff]  ;;  %v29_v3 = vld [vmem:[%s195_s1 + $0x10] sm:$0xff]  ;;  %130 = vmatprep.mubr.msk.bf16.mxu0 %vm141_vm1, %v140_v0  ;;  %20 = vst.msk [vmem:[#allocation2] sm:$0xff] %vm19_vm0, %v140_v0 }
   0x2   :  { %21 = vst.msk [vmem:[#allocation2 + $0x8] sm:$0xff] %vm19_vm0, %v140_v0  ;;  %v31_v4 = vpack.c.bf16 %v28_v2, %v27_v1  ;;  %v30_v5 = vld [vmem:[%s195_s1 + $0x18] sm:$0xff]  ;;  %v24_v7 = vld [vmem:[%s196_s0] sm:$0xff]  ;;  %v25_v8 = vld [vmem:[%s196_s0 + $0x8] sm:$0xff] }
   0x3   :  { %v32_v6 = vpack.c.bf16 %v30_v5, %v29_v3  ;;  %v26_v9 = vpack.c.bf16 %v25_v8, %v24_v7  ;;  %v122_v18 = vld [vmem:[%s197_s2] ss:$0 sm:$0xff] }
   0x4   :  { %127 = vmatpush3.bf16.msra.mxu0 %v31_v4 }
   0x5   :  { %128 = vmatprep.subr.bf16.mxu0 %v140_v0 }
   0x8   :  { %129 = vmatpush3.bf16.msra.mxu0 %v32_v6  ;;  %v22_v10 = vld [vmem:[#allocation2] sm:$0xff] }
   0x9   :  { %v23_v12 = vld [vmem:[#allocation2 + $0x8] sm:$0xff] }
   0xb   :  { %131 = vmatmul.mubr.msk.bf16.vlgmr.msra.gmra.mrb[0].mxu0 %vm33_vm2, %v26_v9 }
  0xde   :  { %v71_v11 = vpop.f32.mrb[0].mxu0 }
  0xdf   :  { %v78_v13 = vadd.f32 %v71_v11, %v22_v10  ;;  %v132_v14 = vpop.f32.mrb[1].mxu0 }
  0xe0   :  { %v74_v15 = vpop.f32.mrb[2].mxu0 }
  0xe1   :  { %81 = vst.msk [vmem:[#allocation2] sm:$0xff] %vm19_vm0, %v78_v13  ;;  %v79_v16 = vadd.f32 %v74_v15, %v23_v12  ;;  %v133_v17 = vpop.f32.mrb[3].mxu0 }
  0xe3   :  { %82 = vst.msk [vmem:[#allocation2 + $0x8] sm:$0xff] %vm19_vm0, %v79_v16 }
  0xe8   :  { %v86_v19 = vld [vmem:[#allocation2] sm:$0xff] }
  0xe9   :  { %v95_v20 = vadd.f32 %v122_v18, %v86_v19 }
  0xea   :  { %v87_v21 = vld [vmem:[#allocation2 + $0x8] sm:$0xff] }
  0xeb   :  { %v99_v22 = vmul.f32 0.044715, %v95_v20  ;;  %v96_v23 = vadd.f32 %v122_v18, %v87_v21  ;;  %v97_v34 = vmul.f32 0.5, %v95_v20 }
  0xed   :  { %v101_v24 = vmul.f32 %v99_v22, %v95_v20  ;;  %v100_v25 = vmul.f32 0.044715, %v96_v23  ;;  %v98_v38 = vmul.f32 0.5, %v96_v23 }
  0xef   :  { %v103_v26 = vmul.f32 %v101_v24, %v95_v20  ;;  %v102_v27 = vmul.f32 %v100_v25, %v96_v23 }
  0xf1   :  { %v105_v28 = vadd.f32 %v103_v26, %v95_v20  ;;  %v104_v29 = vmul.f32 %v102_v27, %v96_v23 }
  0xf3   :  { %v107_v30 = vmul.f32 0.7978846, %v105_v28  ;;  %v106_v31 = vadd.f32 %v104_v29, %v96_v23 }
  0xf5   :  { %136 = vtanh.f32 %v107_v30  ;;  %v108_v32 = vmul.f32 0.7978846, %v106_v31 }
  0xf7   :  { %138 = vtanh.f32 %v108_v32 }
  0xff   :  { %v137_v33 = vpop.eup %136 }
 0x100   :  { %v111_v35 = vadd.f32 1.0, %v137_v33 }
 0x101   :  { %v139_v36 = vpop.eup %138 }
 0x102   :  { %v113_v37 = vmul.f32 %v111_v35, %v97_v34  ;;  %v112_v39 = vadd.f32 1.0, %v139_v36 }
 0x104   :  { %115 = vst.msk [vmem:[%s198_s3] sm:$0xff] %vm19_vm0, %v113_v37  ;;  %v114_v40 = vmul.f32 %v112_v39, %v98_v38 }
 0x106   :  { %116 = vst.msk [vmem:[%s198_s3 + $0x8] sm:$0xff] %vm19_vm0, %v114_v40 }

// kernel: bert_pretrain_forward.14
= control target key start
LH: loop header
LB: loop body
LE: loop exit
PB: predicated region body
PF: predicated region fallthrough
CT: control target
= control target key end

     0   :  { %s1042_s18 = smov 0   ;;  %s1138_s0 = inlined_call_operand.vmem [shape: f32[2,4,8,8], index: 0, kind: input, shape index: {}]   ;;  %s1139_s1 = inlined_call_operand.vmem [shape: f32[2,4,8,8], index: 1, kind: input, shape index: {}]   ;;  %s1140_s2 = inlined_call_operand.vmem [shape: f32[2,4,8,8], index: 2, kind: input, shape index: {}]   ;;  %s1141_s3 = inlined_call_operand.vmem [shape: f32[2,1,8], index: 3, kind: input, shape index: {}]   ;;  %s1142_s4 = inlined_call_operand.vmem [shape: f32[2,4,8,8], index: 4, kind: output, shape index: {0}]   ;;  %s1143_s5 = inlined_call_operand.vmem [shape: f32[2,4,8,8], index: 5, kind: output, shape index: {1}]  }
   0x1 LB: > { %s880_s19 = sadd.s32 4294967295, %s1007_s18   ;;  %p884_p0 = scmp.ge.s32.totalorder %s1007_s18, 1  ;;  %s1007_s18 = sphi %s1042_s18, %s16_s18  }
   0x2   : > { %p218_p1 = scmp.lt.s32.totalorder %s1007_s18, 3 }
   0x4   : > { %p219_p2 = pnand %p884_p0, %p218_p1 }
   0x5   : > { %p264_p3 = scmp.lt.s32.totalorder (!%p219_p2), %s880_s19, 1  ;;  %v1009_v0 = vmov (!%p219_p2), 0.0   ;;  %vm1010_vm0 = vmmov (!%p219_p2), 0   ;;  %vm317_vm1 = vcmask (!%p219_p2), 64512   ;;  %v509_v21 = vlaneseq (!%p219_p2) }
   0x6   : > { %222 = sbr.rel (%p219_p2) target bundleno = 785 (0x311), region = 36  ;;  %926 = vmatprep.subr.bf16.mxu0 (!%p219_p2), %v1009_v0  ;;  %932 = vmatprep.subr.bf16.mxu1 (!%p219_p2), %v1009_v0  ;;  %v1011_v25 = vmov (!%p219_p2), 0   ;;  %vm569_vm4 = vcmask (!%p219_p2), 1043456  }
   0x7   : > { %928 = vmatprep.mubr.msk.bf16.mxu0 (!%p219_p2), %vm1010_vm0, %v1009_v0  ;;  %934 = vmatprep.mubr.msk.bf16.mxu1 (!%p219_p2), %vm1010_vm0, %v1009_v0  ;;  %v510_v23 = vshrl.u32 (!%p219_p2), %v509_v21, 7 }
   0x9   : > { %v511_v24 = vsub.s32 (!%p219_p2), 0, %v510_v23 }
   0xd   : > { %s1145_s19 = smov (!%p264_p3, %s880_s19), 1 }
   0xe   : > { %s1059_s20 = sshll.u32 %s1145_s19, 5  ;;  %s281_s29 = scalar_lea.vmem %s1141_s3, %s1145_s19 }
   0xf   : > { %s273_s23 = scalar_lea.vmem %s1139_s1, %s1059_s20  ;;  %s268_s26 = scalar_lea.vmem %s1138_s0, %s1059_s20  ;;  %v506_v22 = vld [vmem:[%s281_s29] sm:$0x1] }
  0x10   : > { %v301_v1 = vld [vmem:[%s273_s23] sm:$0xff]  ;;  %v302_v2 = vld [vmem:[%s273_s23 + $0x8] sm:$0xff]  ;;  %v303_v5 = vld [vmem:[%s273_s23 + $0x10] sm:$0xff]  ;;  %vm507_vm2 = vcmp.gt.f32.partialorder %v506_v22, 0.5  ;;  %s278_s7 = scalar_lea.vmem %s1140_s2, %s1059_s20  ;;  %s291_s10 = scalar_lea.vmem %s1143_s5, %s1059_s20 }
  0x11   : > { %v305_v3 = vpack.c.bf16 %v301_v1, %v301_v1  ;;  %v306_v4 = vpack.c.bf16 %v302_v2, %v302_v2  ;;  %v304_v6 = vld [vmem:[%s273_s23 + $0x18] sm:$0xff]  ;;  %v293_v9 = vld [vmem:[%s268_s26] sm:$0xff]  ;;  %v294_v10 = vld [vmem:[%s268_s26 + $0x8] sm:$0xff]  ;;  %v307_v11 = vpack.c.bf16 %v303_v5, %v303_v5  ;;  %v508_v26 = vsel %vm507_vm2, 1, %v1011_v25  ;;  %s286_s13 = scalar_lea.vmem %s1142_s4, %s1059_s20 }
  0x12   : > { %v308_v12 = vpack.c.bf16 %v304_v6, %v304_v6  ;;  %v297_v13 = vpack.c.bf16 %v293_v9, %v293_v9  ;;  %v298_v14 = vpack.c.bf16 %v294_v10, %v294_v10  ;;  %v295_v17 = vld [vmem:[%s268_s26 + $0x10] sm:$0xff]  ;;  %v296_v18 = vld [vmem:[%s268_s26 + $0x18] sm:$0xff]  ;;  %v512_v27 = vrot.slane %v508_v26, %v511_v24 }
  0x13   : > { %v322_v7 = vsel %vm317_vm1, %v305_v3, 0  ;;  %v368_v8 = vsel %vm317_vm1, %v306_v4, 0  ;;  %v414_v15 = vsel %vm317_vm1, %v307_v11, 0  ;;  %v299_v19 = vpack.c.bf16 %v295_v17, %v295_v17  ;;  %v312_v22 = vld [vmem:[%s278_s7 + $0x18] sm:$0xff] }
  0x14   : > { %927 = vmatpush3.bf16.xpose.msra.mxu0 %v322_v7  ;;  %933 = vmatpush3.bf16.xpose.msra.mxu1 %v368_v8  ;;  %v460_v16 = vsel %vm317_vm1, %v308_v12, 0  ;;  %v300_v20 = vpack.c.bf16 %v296_v18, %v296_v18  ;;  %vm513_vm3 = vcmp.eq.s32.totalorder %v512_v27, 1  ;;  %v316_v23 = vpack.c.bf16 %v312_v22, %v312_v22 }
  0x15   : > { %938 = vmatprep.subr.bf16.mxu0 %v1009_v0  ;;  %944 = vmatprep.subr.bf16.mxu1 %v1009_v0 }
  0x16   : > { %v709_v24 = vsel %vm569_vm4, %v316_v23, 0 }
  0x1b   : > { %929 = vmatmul.mubr.msk.bf16.vlgmr.msra.gmra.mrb[0].mxu0 %vm317_vm1, %v297_v13  ;;  %935 = vmatmul.mubr.msk.bf16.vlgmr.msra.gmra.mrb[0].mxu1 %vm317_vm1, %v298_v14  ;;  %v309_v13 = vld [vmem:[%s278_s7] sm:$0xff] }
  0x1c   : > { %939 = vmatpush3.bf16.xpose.msra.mxu0 %v414_v15  ;;  %945 = vmatpush3.bf16.xpose.msra.mxu1 %v460_v16  ;;  %v313_v14 = vpack.c.bf16 %v309_v13, %v309_v13  ;;  %v310_v16 = vld [vmem:[%s278_s7 + $0x8] sm:$0xff] }
  0x1d   : > { %940 = vmatprep.mubr.msk.bf16.mxu0 %vm1010_vm0, %v1009_v0  ;;  %946 = vmatprep.mubr.msk.bf16.mxu1 %vm1010_vm0, %v1009_v0  ;;  %v314_v17 = vpack.c.bf16 %v310_v16, %v310_v16 }
  0x1e   : > { %950 = vmatprep.subr.bf16.mxu0 %v1009_v0  ;;  %956 = vmatprep.subr.bf16.mxu1 %v1009_v0  ;;  %v571_v15 = vsel %vm569_vm4, %v313_v14, 0 }
  0x1f   : > { %v617_v18 = vsel %vm569_vm4, %v314_v17, 0 }
  0x23   : > { %941 = vmatmul.mubr.msk.bf16.vlgmr.msra.gmra.mrb[4].mxu0 %vm317_vm1, %v299_v19  ;;  %947 = vmatmul.mubr.msk.bf16.vlgmr.msra.gmra.mrb[4].mxu1 %vm317_vm1, %v300_v20  ;;  %v311_v19 = vld [vmem:[%s278_s7 + $0x10] sm:$0xff] }
  0x24   : > { %952 = vmatprep.mubr.msk.bf16.mxu0 %vm1010_vm0, %v1009_v0  ;;  %958 = vmatprep.mubr.msk.bf16.mxu1 %vm1010_vm0, %v1009_v0  ;;  %v315_v20 = vpack.c.bf16 %v311_v19, %v311_v19 }
  0x25   : > { %951 = vmatpush3.bf16.msra.mxu0 %v571_v15  ;;  %957 = vmatpush3.bf16.msra.mxu1 %v617_v18 }
  0x26   : > { %962 = vmatprep.subr.bf16.mxu0 %v1009_v0  ;;  %968 = vmatprep.subr.bf16.mxu1 %v1009_v0  ;;  %v663_v21 = vsel %vm569_vm4, %v315_v20, 0 }
  0xee   : > { %v358_v28 = vpop.f32.mrb[0].mxu0  ;;  %v404_v29 = vpop.f32.mrb[0].mxu1 }
  0xef   : > { %v502_v30 = vmul.f32 0.35355338, %v358_v28  ;;  %v930_v31 = vpop.f32.mrb[1].mxu0  ;;  %v503_v32 = vmul.f32 0.35355338, %v404_v29  ;;  %v936_v33 = vpop.f32.mrb[1].mxu1 }
  0xf0   : > { %v361_v34 = vpop.f32.mrb[2].mxu0  ;;  %v407_v35 = vpop.f32.mrb[2].mxu1 }
  0xf1   : > { %v931_v36 = vpop.f32.mrb[3].mxu0  ;;  %v937_v37 = vpop.f32.mrb[3].mxu1  ;;  %v514_v38 = vsel %vm513_vm3, -1e+09, %v502_v30  ;;  %v515_v39 = vsel %vm513_vm3, -1e+09, %v503_v32 }
  0xf2   : > { %v518_v40 = vsel %vm317_vm1, %v514_v38, -inf  ;;  %v521_v41 = vsel %vm317_vm1, %v515_v39, -inf }
  0xf3   : > { %519 = vmax.xlane.f32.xlu0 %v518_v40 }
  0xf6   : > { %v450_v42 = vpop.f32.mrb[4].mxu0  ;;  %v496_v43 = vpop.f32.mrb[4].mxu1 }
  0xf7   : > { %v504_v44 = vmul.f32 0.35355338, %v450_v42  ;;  %522 = vmax.xlane.f32.xlu0 %v521_v41  ;;  %v942_v45 = vpop.f32.mrb[5].mxu0  ;;  %v505_v46 = vmul.f32 0.35355338, %v496_v43  ;;  %v948_v47 = vpop.f32.mrb[5].mxu1 }
  0xf8   : > { %v453_v48 = vpop.f32.mrb[6].mxu0  ;;  %v499_v49 = vpop.f32.mrb[6].mxu1 }
  0xf9   : > { %v943_v50 = vpop.f32.mrb[7].mxu0  ;;  %v949_v51 = vpop.f32.mrb[7].mxu1  ;;  %v516_v52 = vsel %vm513_vm3, -1e+09, %v504_v44  ;;  %v517_v53 = vsel %vm513_vm3, -1e+09, %v505_v46 }
  0xfa   : > { %v524_v54 = vsel %vm317_vm1, %v516_v52, -inf  ;;  %v527_v55 = vsel %vm317_vm1, %v517_v53, -inf }
  0xfb   : > { %525 = vmax.xlane.f32.xlu1 %v524_v54 }
  0xff   : > { %528 = vmax.xlane.f32.xlu1 %v527_v55 }
 0x180   : > { %v520_v56 = vpop.xlane.xlu0 %519 }
 0x181   : > { %v530_v57 = vsub.f32 %v514_v38, %v520_v56 }
 0x183   : > { %v534_v58 = vmul.f32 1.442695, %v530_v57 }
 0x184   : > { %v523_v59 = vpop.xlane.xlu0 %522 }
 0x185   : > { %985 = vpow2.f32 %v534_v58  ;;  %v531_v60 = vsub.f32 %v515_v39, %v523_v59 }
 0x187   : > { %v536_v61 = vmul.f32 1.442695, %v531_v60 }
 0x188   : > { %v526_v62 = vpop.xlane.xlu1 %525 }
 0x189   : > { %987 = vpow2.f32 %v536_v61  ;;  %v532_v63 = vsub.f32 %v516_v52, %v526_v62 }
 0x18b   : > { %v538_v1 = vmul.f32 1.442695, %v532_v63 }
 0x18c   : > { %v529_v2 = vpop.xlane.xlu1 %528 }
 0x18d   : > { %989 = vpow2.f32 %v538_v1  ;;  %v533_v3 = vsub.f32 %v517_v53, %v529_v2 }
 0x18f   : > { %v986_v4 = vpop.eup %985  ;;  %v540_v5 = vmul.f32 1.442695, %v533_v3 }
 0x190   : > { %v542_v6 = vsel %vm317_vm1, %v986_v4, 0.0 }
 0x191   : > { %991 = vpow2.f32 %v540_v5  ;;  %543 = vadd.xlane.f32.xlu0 %v542_v6 }
 0x193   : > { %v988_v7 = vpop.eup %987 }
 0x194   : > { %v545_v8 = vsel %vm317_vm1, %v988_v7, 0.0 }
 0x195   : > { %546 = vadd.xlane.f32.xlu1 %v545_v8 }
 0x197   : > { %v990_v9 = vpop.eup %989 }
 0x198   : > { %v548_v10 = vsel %vm317_vm1, %v990_v9, 0.0 }
 0x199   : > { %549 = vadd.xlane.f32.xlu0 %v548_v10 }
 0x19b   : > { %v992_v11 = vpop.eup %991 }
 0x19c   : > { %v551_v12 = vsel %vm317_vm1, %v992_v11, 0.0 }
 0x19d   : > { %552 = vadd.xlane.f32.xlu1 %v551_v12 }
 0x21e   : > { %v544_v25 = vpop.xlane.xlu0 %543 }
 0x21f   : > { %993 = vrcp.f32 %v544_v25 }
 0x222   : > { %v547_v26 = vpop.xlane.xlu1 %546 }
 0x223   : > { %995 = vrcp.f32 %v547_v26 }
 0x226   : > { %v550_v27 = vpop.xlane.xlu0 %549 }
 0x227   : > { %997 = vrcp.f32 %v550_v27 }
 0x229   : > { %v994_v28 = vpop.eup %993 }
 0x22a   : > { %v558_v29 = vmul.f32 %v994_v28, %v986_v4  ;;  %v553_v30 = vpop.xlane.xlu1 %552 }
 0x22b   : > { %999 = vrcp.f32 %v553_v30 }
 0x22c   : > { %755 = vst.msk [vmem:[%s291_s10] sm:$0xff] %vm317_vm1, %v558_v29  ;;  %v562_v31 = vpack.c.bf16 %v558_v29, %v558_v29 }
 0x22d   : > { %v996_v32 = vpop.eup %995 }
 0x22e   : > { %v559_v33 = vmul.f32 %v996_v32, %v988_v7  ;;  %953 = vmatmul.mubr.msk.bf16.vlgmr.msra.gmra.mrb[8].mxu0 %vm317_vm1, %v562_v31 }
 0x22f   : > { %963 = vmatpush3.bf16.msra.mxu0 %v663_v21  ;;  %964 = vmatprep.mubr.msk.bf16.mxu0 %vm1010_vm0, %v1009_v0 }
 0x230   : > { %756 = vst.msk [vmem:[%s291_s10 + $0x8] sm:$0xff] %vm317_vm1, %v559_v33  ;;  %v563_v34 = vpack.c.bf16 %v559_v33, %v559_v33 }
 0x231   : > { %v998_v35 = vpop.eup %997 }
 0x232   : > { %v560_v36 = vmul.f32 %v998_v35, %v990_v9  ;;  %959 = vmatmul.mubr.msk.bf16.vlgmr.msra.gmra.mrb[8].mxu1 %vm317_vm1, %v563_v34 }
 0x233   : > { %969 = vmatpush3.bf16.msra.mxu1 %v709_v24  ;;  %970 = vmatprep.mubr.msk.bf16.mxu1 %vm1010_vm0, %v1009_v0 }
 0x234   : > { %757 = vst.msk [vmem:[%s291_s10 + $0x10] sm:$0xff] %vm317_vm1, %v560_v36  ;;  %v564_v37 = vpack.c.bf16 %v560_v36, %v560_v36 }
 0x235   : > { %v1000_v38 = vpop.eup %999 }
 0x236   : > { %v561_v39 = vmul.f32 %v1000_v38, %v992_v11  ;;  %965 = vmatmul.mubr.msk.bf16.vlgmr.msra.gmra.mrb[12].mxu0 %vm317_vm1, %v564_v37 }
 0x238   : > { %758 = vst.msk [vmem:[%s291_s10 + $0x18] sm:$0xff] %vm317_vm1, %v561_v39  ;;  %v565_v40 = vpack.c.bf16 %v561_v39, %v561_v39 }
 0x23a   : > { %971 = vmatmul.mubr.msk.bf16.vlgmr.msra.gmra.mrb[12].mxu1 %vm317_vm1, %v565_v40 }
 0x301   : > { %v607_v41 = vpop.f32.mrb[8].mxu0 }
 0x302   : > { %751 = vst.msk [vmem:[%s286_s13] sm:$0xff] %vm317_vm1, %v607_v41  ;;  %v954_v0 = vpop.f32.mrb[9].mxu0 }
 0x303   : > { %v610_v42 = vpop.f32.mrb[10].mxu0 }
 0x304   : > { %v955_v43 = vpop.f32.mrb[11].mxu0 }
 0x305   : > { %v653_v44 = vpop.f32.mrb[8].mxu1 }
 0x306   : > { %752 = vst.msk [vmem:[%s286_s13 + $0x8] sm:$0xff] %vm317_vm1, %v653_v44  ;;  %v960_v45 = vpop.f32.mrb[9].mxu1 }
 0x307   : > { %v656_v46 = vpop.f32.mrb[10].mxu1 }
 0x308   : > { %v961_v47 = vpop.f32.mrb[11].mxu1 }
 0x309   : > { %v699_v48 = vpop.f32.mrb[12].mxu0 }
 0x30a   : > { %753 = vst.msk [vmem:[%s286_s13 + $0x10] sm:$0xff] %vm317_vm1, %v699_v48  ;;  %v966_v49 = vpop.f32.mrb[13].mxu0 }
 0x30b   : > { %v702_v50 = vpop.f32.mrb[14].mxu0 }
 0x30c   : > { %v967_v51 = vpop.f32.mrb[15].mxu0 }
 0x30d   : > { %v745_v52 = vpop.f32.mrb[12].mxu1 }
 0x30e   : > { %754 = vst.msk [vmem:[%s286_s13 + $0x18] sm:$0xff] %vm317_vm1, %v745_v52  ;;  %v972_v53 = vpop.f32.mrb[13].mxu1 }
 0x30f   : > { %v748_v54 = vpop.f32.mrb[14].mxu1 }
 0x310   : > { %v973_v55 = vpop.f32.mrb[15].mxu1 }
 0x311 PF: > { %s16_s18 = sadd.s32 1, %s1007_s18  }
 0x312   : > { %p13_p4 = scmp.ge.s32.totalorder %s16_s18, 4  }
 0x314   :  { %15 = sbr.rel (!%p13_p4) target bundleno = 1 (0x1), region = 87 }

// kernel: bert_pretrain_forward.23
= control target key start
LH: loop header
LB: loop body
LE: loop exit
PB: predicated region body
PF: predicated region fallthrough
CT: control target
= control target key end

     0   :  { %vm19_vm0 = vcmask 254976   ;;  %v112_v0 = vmov 0.0   ;;  %vm113_vm1 = vmmov 0   ;;  %vm30_vm2 = vcmask 261120   ;;  %s158_s1 = inlined_call_operand.vmem [shape: f32[32,32], index: 1, kind: input, shape index: {}]   ;;  %s159_s0 = inlined_call_operand.vmem [shape: f32[2,32], index: 0, kind: input, shape index: {}]   ;;  %s160_s2 = inlined_call_operand.vmem [shape: f32[1,32], index: 2, kind: input, shape index: {}]   ;;  %s161_s3 = inlined_call_operand.vmem [shape: f32[2,32], index: 3, kind: output, shape index: {}]  }
   0x1   :  { %20 = vst.msk [vmem:[#allocation2] sm:$0x3] %vm19_vm0, %v112_v0  ;;  %100 = vmatprep.subr.bf16.mxu0 %v112_v0  ;;  %v24_v1 = vld [vmem:[%s158_s1] sm:$0xff]  ;;  %v25_v2 = vld [vmem:[%s158_s1 + $0x8] sm:$0xff]  ;;  %v26_v3 = vld [vmem:[%s158_s1 + $0x10] sm:$0xff]  ;;  %104 = vmatprep.mubr.msk.bf16.mxu0 %vm113_vm1, %v112_v0 }
   0x2   :  { %v28_v4 = vpack.c.bf16 %v25_v2, %v24_v1  ;;  %v27_v5 = vld [vmem:[%s158_s1 + $0x18] sm:$0xff]  ;;  %v22_v7 = vld [vmem:[%s159_s0] sm:$0x3] }
   0x3   :  { %v29_v6 = vpack.c.bf16 %v27_v5, %v26_v3  ;;  %v23_v8 = vpack.c.bf16 %v22_v7, %v22_v7  ;;  %v96_v15 = vld [vmem:[%s160_s2] ss:$0 sm:$0xff] }
   0x4   :  { %101 = vmatpush3.bf16.msra.mxu0 %v28_v4 }
   0x5   :  { %102 = vmatprep.subr.bf16.mxu0 %v112_v0 }
   0x8   :  { %103 = vmatpush3.bf16.msra.mxu0 %v29_v6  ;;  %v21_v9 = vld [vmem:[#allocation2] sm:$0x3] }
   0xb   :  { %105 = vmatmul.mubr.msk.bf16.vlgmr.msra.gmra.mrb[0].mxu0 %vm30_vm2, %v23_v8 }
  0xde   :  { %v68_v10 = vpop.f32.mrb[0].mxu0 }
  0xdf   :  { %v74_v11 = vadd.f32 %v68_v10, %v21_v9  ;;  %v106_v12 = vpop.f32.mrb[1].mxu0 }
  0xe0   :  { %v71_v13 = vpop.f32.mrb[2].mxu0 }
  0xe1   :  { %76 = vst.msk [vmem:[#allocation2] sm:$0x3] %vm19_vm0, %v74_v11  ;;  %v107_v14 = vpop.f32.mrb[3].mxu0 }
  0xe8   :  { %v80_v16 = vld [vmem:[#allocation2] sm:$0x3] }
  0xe9   :  { %v88_v17 = vadd.f32 %v96_v15, %v80_v16 }
  0xeb   :  { %110 = vtanh.f32 %v88_v17 }
  0xf5   :  { %v111_v18 = vpop.eup %110 }
  0xf6   :  { %90 = vst.msk [vmem:[%s161_s3] sm:$0x3] %vm19_vm0, %v111_v18 }

// kernel: bert_pretrain_forward.24
= control target key start
LH: loop header
LB: loop body
LE: loop exit
PB: predicated region body
PF: predicated region fallthrough
CT: control target
= control target key end

     0   :  { %v133_v3 = vmov 0.0   ;;  %vm134_vm0 = vmmov 0   ;;  %vm17_vm1 = vcmask 9216   ;;  %s181_s0 = inlined_call_operand.vmem [shape: f32[2,32], index: 0, kind: input, shape index: {}]   ;;  %s182_s1 = inlined_call_operand.vmem [shape: f32[32,2], index: 1, kind: input, shape index: {}]   ;;  %s183_s2 = inlined_call_operand.hbm [shape: f32[2,2], index: 2, kind: output, shape index: {}]  }
   0x1   :  { %v22_v0 = vld [vmem:[%s182_s1] sm:$0xff]  ;;  %v23_v1 = vld [vmem:[%s182_s1 + $0x8] sm:$0xff]  ;;  %v24_v2 = vld [vmem:[%s182_s1 + $0x10] sm:$0xff]  ;;  %98 = vmatprep.subr.bf16.mxu0 %v133_v3  ;;  %102 = vmatprep.mubr.msk.bf16.mxu0 %vm134_vm0, %v133_v3 }
   0x2   :  { %v26_v4 = vpack.c.bf16 %v23_v1, %v22_v0  ;;  %v25_v5 = vld [vmem:[%s182_s1 + $0x18] sm:$0xff] }
   0x3   :  { %7 = vsyncpa [#allocation4], 0  ;;  %18 = vst.msk [vmem:[#allocation2] sm:$0x3] %vm17_vm1, %v133_v3  ;;  %v27_v6 = vpack.c.bf16 %v25_v5, %v24_v2  ;;  %v20_v7 = vld [vmem:[%s181_s0] sm:$0x3] }
   0x4   :  { %99 = vmatpush3.bf16.msra.mxu0 %v26_v4  ;;  %v21_v8 = vpack.c.bf16 %v20_v7, %v20_v7  ;;  %vm28_vm2 = vcmask 261120   ;;  %s135_s1 = smov [#allocation3]  }
   0x5   :  { %100 = vmatprep.subr.bf16.mxu0 %v133_v3  ;;  %s86_s19 = sshll.u32 %s135_s1, 4  ;;  %s87_s19 = int_to_ptr.vmem [resolvable:$true] %s86_s19 }
   0x6   :  { %s109_s0 = scalar_lea.vmem %s87_s19, 32  ;;  %p114_p1 = scmp.lt.s32.totalorder %s87_s19, %s87_s19 }
   0x7   :  { %p110_p0 = scmp.ne.s32.totalorder %s87_s19, %s109_s0  ;;  %p115_p2 = scmp.lt.s32.totalorder %s109_s0, %s109_s0 }
   0x8   :  { %101 = vmatpush3.bf16.msra.mxu0 %v27_v6 }
   0x9   :  { %p116_p3 = por %p115_p2, %p114_p1 }
   0xa   :  { %v19_v9 = vld [vmem:[#allocation2] sm:$0x3] }
   0xb   :  { %103 = vmatmul.mubr.msk.bf16.vlgmr.msra.gmra.mrb[0].mxu0 %vm28_vm2, %v21_v8  ;;  %p117_p4 = pnand %p116_p3, %p110_p0 }
  0xde   :  { %v66_v10 = vpop.f32.mrb[0].mxu0 }
  0xdf   :  { %v72_v11 = vadd.f32 %v66_v10, %v19_v9  ;;  %v104_v12 = vpop.f32.mrb[1].mxu0 }
  0xe0   :  { %v69_v13 = vpop.f32.mrb[2].mxu0 }
  0xe1   :  { %74 = vst.msk [vmem:[#allocation2] sm:$0x3] %vm17_vm1, %v72_v11  ;;  %v105_v14 = vpop.f32.mrb[3].mxu0 }
  0xe8   :  { %v78_v15 = vld [vmem:[#allocation2] sm:$0x3] }
  0xe9   :  { %79 = vst.msk [vmem:[#allocation3] sm:$0x3] %vm17_vm1, %v78_v15 }
  0xea   :  { %120 = shalt.err (!%p117_p4)
}
  0xeb   :  { %s121_s22 = scalar_lea.hbm %s183_s2, 32 }
  0xec   :  { %p122_p5 = scmp.ne.s32.totalorder %s183_s2, %s121_s22  ;;  %p125_p6 = scmp.lt.u32.totalorder %s121_s22, %s183_s2 }
  0xee   :  { %p127_p7 = pnand %p125_p6, %p122_p5 }
  0xf0   :  { %130 = shalt.err (!%p127_p7)
}
  0xf1   :  { %89 = dma.vmem_to_hbm [thread:$0]  %s87_s19, 32, %s183_s2, [#allocation4]  }
  0xf2   :  { %131 = dma.done.wait [#allocation4], 32  }
  0xf3   :  { %132 = vsyncadd [#allocation4], 4294967264 }
  0xf4   :  { %93 = vsyncpa [#allocation4], 1 }

// kernel: bert_pretrain_forward.17
= control target key start
LH: loop header
LB: loop body
LE: loop exit
PB: predicated region body
PF: predicated region fallthrough
CT: control target
= control target key end

     0   :  { %vm28_vm0 = vcmask 261120   ;;  %v194_v0 = vmov 0.0   ;;  %vm195_vm1 = vmmov 0   ;;  %vm48_vm2 = vcmask 523264   ;;  %s292_s1 = inlined_call_operand.vmem [shape: f32[64,32], index: 1, kind: input, shape index: {}]   ;;  %s293_s0 = inlined_call_operand.vmem [shape: f32[16,64], index: 0, kind: input, shape index: {}]   ;;  %s294_s2 = inlined_call_operand.vmem [shape: f32[1,32], index: 2, kind: input, shape index: {}]   ;;  %s295_s3 = inlined_call_operand.vmem [shape: f32[16,32], index: 3, kind: input, shape index: {}]   ;;  %s296_s4 = inlined_call_operand.vmem [shape: f32[1,32], index: 4, kind: input, shape index: {}]   ;;  %s297_s5 = inlined_call_operand.vmem [shape: f32[1,32], index: 5, kind: input, shape index: {}]   ;;  %s298_s6 = inlined_call_operand.vmem [shape: f32[16,32], index: 6, kind: output, shape index: {}]  }
   0x1   :  { %176 = vmatprep.subr.bf16.mxu0 %v194_v0  ;;  %v36_v1 = vld [vmem:[%s292_s1] sm:$0xff]  ;;  %v37_v2 = vld [vmem:[%s292_s1 + $0x8] sm:$0xff]  ;;  %v38_v3 = vld [vmem:[%s292_s1 + $0x10] sm:$0xff]  ;;  %184 = vmatprep.mubr.msk.bf16.mxu0 %vm195_vm1, %v194_v0  ;;  %29 = vst.msk [vmem:[#allocation2] sm:$0xff] %vm28_vm0, %v194_v0 }
   0x2   :  { %30 = vst.msk [vmem:[#allocation2 + $0x8] sm:$0xff] %vm28_vm0, %v194_v0  ;;  %v44_v4 = vpack.c.bf16 %v37_v2, %v36_v1  ;;  %v39_v5 = vld [vmem:[%s292_s1 + $0x18] sm:$0xff]  ;;  %v40_v7 = vld [vmem:[%s292_s1 + $0x20] sm:$0xff]  ;;  %v41_v8 = vld [vmem:[%s292_s1 + $0x28] sm:$0xff] }
   0x3   :  { %v45_v6 = vpack.c.bf16 %v39_v5, %v38_v3  ;;  %v46_v9 = vpack.c.bf16 %v41_v8, %v40_v7  ;;  %v42_v10 = vld [vmem:[%s292_s1 + $0x30] sm:$0xff]  ;;  %v43_v11 = vld [vmem:[%s292_s1 + $0x38] sm:$0xff]  ;;  %v33_v13 = vld [vmem:[%s293_s0] sm:$0xff] }
   0x4   :  { %177 = vmatpush3.bf16.msra.mxu0 %v44_v4  ;;  %v47_v12 = vpack.c.bf16 %v43_v11, %v42_v10  ;;  %v34_v14 = vld [vmem:[%s293_s0 + $0x8] sm:$0xff]  ;;  %v168_v24 = vld [vmem:[%s294_s2] ss:$0 sm:$0xff] }
   0x5   :  { %178 = vmatprep.subr.bf16.mxu0 %v194_v0  ;;  %v35_v15 = vpack.c.bf16 %v34_v14, %v33_v13  ;;  %v112_v26 = vld [vmem:[%s295_s3] sm:$0xff]  ;;  %v113_v29 = vld [vmem:[%s295_s3 + $0x8] sm:$0xff] }
   0x6   :  { %v169_v52 = vld [vmem:[%s296_s4] ss:$0 sm:$0xff] }
   0x7   :  { %v170_v54 = vld [vmem:[%s297_s5] ss:$0 sm:$0xff] }
   0x8   :  { %179 = vmatpush3.bf16.msra.mxu0 %v45_v6  ;;  %v31_v16 = vld [vmem:[#allocation2] sm:$0xff] }
   0x9   :  { %180 = vmatprep.subr.bf16.mxu0 %v194_v0  ;;  %v32_v18 = vld [vmem:[#allocation2 + $0x8] sm:$0xff] }
   0xc   :  { %181 = vmatpush3.bf16.msra.mxu0 %v46_v9 }
   0xd   :  { %182 = vmatprep.subr.bf16.mxu0 %v194_v0 }
  0x10   :  { %183 = vmatpush3.bf16.msra.mxu0 %v47_v12 }
  0x13   :  { %185 = vmatmul.mubr.msk.bf16.vlgmr.msra.gmra.mrb[0].mxu0 %vm48_vm2, %v35_v15 }
  0xe6   :  { %v86_v17 = vpop.f32.mrb[0].mxu0 }
  0xe7   :  { %v93_v19 = vadd.f32 %v86_v17, %v31_v16  ;;  %v186_v20 = vpop.f32.mrb[1].mxu0 }
  0xe8   :  { %v89_v21 = vpop.f32.mrb[2].mxu0 }
  0xe9   :  { %96 = vst.msk [vmem:[#allocation2] sm:$0xff] %vm28_vm0, %v93_v19  ;;  %v94_v22 = vadd.f32 %v89_v21, %v32_v18  ;;  %v187_v23 = vpop.f32.mrb[3].mxu0 }
  0xeb   :  { %97 = vst.msk [vmem:[#allocation2 + $0x8] sm:$0xff] %vm28_vm0, %v94_v22 }
  0xf0   :  { %v101_v25 = vld [vmem:[#allocation2] sm:$0xff] }
  0xf1   :  { %v110_v27 = vadd.f32 %v168_v24, %v101_v25 }
  0xf2   :  { %v102_v28 = vld [vmem:[#allocation2 + $0x8] sm:$0xff] }
  0xf3   :  { %v114_v30 = vadd.f32 %v112_v26, %v110_v27  ;;  %v111_v31 = vadd.f32 %v168_v24, %v102_v28 }
  0xf5   :  { %v116_v32 = vsel %vm28_vm0, %v114_v30, 0.0  ;;  %v115_v33 = vadd.f32 %v113_v29, %v111_v31 }
  0xf6   :  { %117 = vadd.xlane.f32.xlu0 %v116_v32 }
  0xf7   :  { %v119_v34 = vsel %vm28_vm0, %v115_v33, 0.0 }
  0xfa   :  { %120 = vadd.xlane.f32.xlu0 %v119_v34 }
 0x183   :  { %v118_v35 = vpop.xlane.xlu0 %117 }
 0x184   :  { %v123_v36 = vmul.f32 0.03125, %v118_v35 }
 0x186   :  { %v125_v37 = vsub.f32 %v114_v30, %v123_v36 }
 0x187   :  { %v121_v38 = vpop.xlane.xlu0 %120 }
 0x188   :  { %v124_v39 = vmul.f32 0.03125, %v121_v38  ;;  %v127_v40 = vmul.f32 %v125_v37, %v125_v37 }
 0x18a   :  { %v126_v41 = vsub.f32 %v115_v33, %v124_v39  ;;  %v129_v42 = vsel %vm28_vm0, %v127_v40, 0.0 }
 0x18b   :  { %130 = vadd.xlane.f32.xlu1 %v129_v42 }
 0x18c   :  { %v128_v43 = vmul.f32 %v126_v41, %v126_v41 }
 0x18e   :  { %v132_v44 = vsel %vm28_vm0, %v128_v43, 0.0 }
 0x18f   :  { %133 = vadd.xlane.f32.xlu1 %v132_v44 }
 0x218   :  { %v131_v45 = vpop.xlane.xlu1 %130 }
 0x219   :  { %v135_v46 = vmul.f32 0.03125, %v131_v45 }
 0x21b   :  { %v137_v47 = vadd.f32 1e-05, %v135_v46 }
 0x21c   :  { %v134_v48 = vpop.xlane.xlu1 %133 }
 0x21d   :  { %190 = vrsqrt.f32 %v137_v47  ;;  %v136_v49 = vmul.f32 0.03125, %v134_v48 }
 0x21f   :  { %v138_v50 = vadd.f32 1e-05, %v136_v49 }
 0x221   :  { %192 = vrsqrt.f32 %v138_v50 }
 0x227   :  { %v191_v51 = vpop.eup %190 }
 0x228   :  { %v141_v53 = vmul.f32 %v191_v51, %v125_v37 }
 0x22a   :  { %v150_v55 = vmul.f32 %v169_v52, %v141_v53 }
 0x22b   :  { %v193_v56 = vpop.eup %192 }
 0x22c   :  { %v159_v57 = vadd.f32 %v170_v54, %v150_v55  ;;  %v142_v58 = vmul.f32 %v193_v56, %v126_v41 }
 0x22e   :  { %161 = vst.msk [vmem:[%s298_s6] sm:$0xff] %vm28_vm0, %v159_v57  ;;  %v151_v59 = vmul.f32 %v169_v52, %v142_v58 }
 0x230   :  { %v160_v60 = vadd.f32 %v170_v54, %v151_v59 }
 0x232   :  { %162 = vst.msk [vmem:[%s298_s6 + $0x8] sm:$0xff] %vm28_vm0, %v160_v60 }

// kernel: bert_pretrain_forward.25
= control target key start
LH: loop header
LB: loop body
LE: loop exit
PB: predicated region body
PF: predicated region fallthrough
CT: control target
= control target key end

     0   :  { %v143_v3 = vmov 0.0   ;;  %vm144_vm0 = vmmov 0   ;;  %s193_s0 = inlined_call_operand.vmem [shape: f32[16,32], index: 0, kind: input, shape index: {}]   ;;  %s194_s1 = inlined_call_operand.vmem [shape: f32[32,128], index: 1, kind: input, shape index: {}]   ;;  %s195_s2 = inlined_call_operand.hbm [shape: f32[16,128], index: 2, kind: output, shape index: {}]  }
   0x1   :  { %v24_v0 = vld [vmem:[%s194_s1] sm:$0xff]  ;;  %v25_v1 = vld [vmem:[%s194_s1 + $0x8] sm:$0xff]  ;;  %v26_v2 = vld [vmem:[%s194_s1 + $0x10] sm:$0xff]  ;;  %106 = vmatprep.subr.bf16.mxu0 %v143_v3  ;;  %110 = vmatprep.mubr.msk.bf16.mxu0 %vm144_vm0, %v143_v3 }
   0x2   :  { %v28_v4 = vpack.c.bf16 %v25_v1, %v24_v0  ;;  %v27_v5 = vld [vmem:[%s194_s1 + $0x18] sm:$0xff] }
   0x3   :  { %7 = vsyncpa [#allocation4], 0  ;;  %v29_v6 = vpack.c.bf16 %v27_v5, %v26_v2  ;;  %v21_v7 = vld [vmem:[%s193_s0] sm:$0xff]  ;;  %v22_v8 = vld [vmem:[%s193_s0 + $0x8] sm:$0xff]  ;;  %vm30_vm1 = vcmask 261120   ;;  %s145_s21 = smov [#allocation3]  }
   0x4   :  { %107 = vmatpush3.bf16.msra.mxu0 %v28_v4  ;;  %v23_v9 = vpack.c.bf16 %v22_v8, %v21_v7  ;;  %s91_s1 = sshll.u32 %s145_s21, 4  ;;  %s92_s1 = int_to_ptr.vmem [resolvable:$true] %s91_s1 }
   0x5   :  { %108 = vmatprep.subr.bf16.mxu0 %v143_v3  ;;  %s119_s22 = scalar_lea.vmem %s92_s1, 256  ;;  %p124_p1 = scmp.lt.s32.totalorder %s92_s1, %s92_s1 }
   0x6   :  { %p120_p0 = scmp.ne.s32.totalorder %s92_s1, %s119_s22  ;;  %p125_p2 = scmp.lt.s32.totalorder %s119_s22, %s119_s22 }
   0x8   :  { %109 = vmatpush3.bf16.msra.mxu0 %v29_v6  ;;  %p126_p3 = por %p125_p2, %p124_p1 }
   0xa   :  { %p127_p4 = pnand %p126_p3, %p120_p0 }
   0xb   :  { %111 = vmatmul.mubr.msk.bf16.vlgmr.msra.gmra.mrb[0].mxu0 %vm30_vm1, %v23_v9 }
  0xde   :  { %v68_v10 = vpop.f32.mrb[0].mxu0 }
  0xdf   :  { %84 = vst [vmem:[#allocation3] sm:$0xff] %v68_v10  ;;  %v112_v11 = vpop.f32.mrb[1].mxu0 }
  0xe0   :  { %v71_v12 = vpop.f32.mrb[2].mxu0 }
  0xe1   :  { %85 = vst [vmem:[#allocation3 + $0x8] sm:$0xff] %v71_v12  ;;  %v113_v13 = vpop.f32.mrb[3].mxu0 }
  0xe2   :  { %130 = shalt.err (!%p127_p4)
}
  0xe3   :  { %s131_s24 = scalar_lea.hbm %s195_s2, 256 }
  0xe4   :  { %p132_p5 = scmp.ne.s32.totalorder %s195_s2, %s131_s24  ;;  %p135_p6 = scmp.lt.u32.totalorder %s131_s24, %s195_s2 }
  0xe6   :  { %p137_p7 = pnand %p135_p6, %p132_p5 }
  0xe8   :  { %140 = shalt.err (!%p137_p7)
}
  0xe9   :  { %s146_s29 = smov 128   ;;  %s147_s30 = smov 8  }
  0xea   :  { %97 = dma.vmem_to_hbm [thread:$0]  %s92_s1, 256, %s195_s2, [#allocation4], %s146_s29, %s146_s29, %s147_s30  }
  0xeb   :  { %141 = dma.done.wait [#allocation4], 256  }
  0xec   :  { %142 = vsyncadd [#allocation4], 4294967040 }
  0xed   :  { %101 = vsyncpa [#allocation4], 1 }

</bundles_post_ra>
